<compile_context>
chip_gen: v5e
topology: v5e:2x2
jax: 0.10.0
libtpu: 0.0.40
codegen_flags: <defaults>
</compile_context>

<pallas_src>
import functools
import math

import jax
import jax.numpy as jnp
from jax.experimental import pallas as pl
from jax.experimental.pallas import tpu as pltpu  # noqa: F401  (TPU-specific tuning hooks)


# ----------------------------------------------------------------------------
# Fused Pallas kernel: all LSTM layers + last-timestep ReLU + FC
# ----------------------------------------------------------------------------
def _lstm_net_kernel(n_layers, T, B, H, fc_as_reduce, x_ref, h0_ref, c0_ref, *refs):
    """refs = [wih_t, whh_t, bias] * n_layers, wfc, bfc, out_ref, hN_ref, cN_ref."""
    w_refs = refs[:3 * n_layers]
    wfc_ref = refs[3 * n_layers]
    bfc_ref = refs[3 * n_layers + 1]
    out_ref = refs[3 * n_layers + 2]
    hN_ref = refs[3 * n_layers + 3]
    cN_ref = refs[3 * n_layers + 4]

    f32 = jnp.float32
    bf16 = jnp.bfloat16

    # ---- hoisted gate masks: one iota + compare for the whole kernel --------
    # pre:  0.5 on i/f/o lanes, 1.0 on g lanes  (also reused as post-multiplier)
    # post: 0.5 on i/f/o lanes, 0.0 on g lanes
    lane = jax.lax.broadcasted_iota(jnp.int32, (B, 4 * H), 1)
    is_g = (lane >= 2 * H) & (lane < 3 * H)
    pre = jnp.where(is_g, 1.0, 0.5).astype(f32)
    post_add = jnp.where(is_g, 0.0, 0.5).astype(f32)

    # ---- layer-0 input projection for ALL timesteps: one tall bf16 matmul ---
    proj0 = (jnp.dot(x_ref[...], w_refs[0][...], preferred_element_type=f32)
             + w_refs[2][...])                               # (T*B, 4H) f32
    proj_slices = [proj0[t * B:(t + 1) * B, :] for t in range(T)]

    h = None
    for l in range(n_layers):
        whh = w_refs[3 * l + 1][...]                         # (H, 4H) bf16
        have_next = l + 1 < n_layers
        if have_next:
            wih_next = w_refs[3 * (l + 1)][...]              # (H, 4H) bf16
            bias_next = w_refs[3 * (l + 1) + 2][...]         # (1, 4H) f32

        h = h0_ref[l]                                        # (B, H) f32
        c = c0_ref[l]                                        # (B, H) f32
        h_b = h.astype(bf16)                                 # MXU operand
        next_slices = []
        for t in range(T):                                   # static unroll: h/c stay in vregs
            gates = proj_slices[t] + jnp.dot(
                h_b, whh, preferred_element_type=f32)        # (B, 4H) f32

            # Single EUP pass over the whole tile:
            #   i/f/o lanes: 0.5*tanh(0.5*x)+0.5 == sigmoid(x)
            #   g lanes    : tanh(x)
            y = jnp.tanh(gates * pre)
            act = y * pre + post_add
            i_g = act[:, 0 * H:1 * H]
            f_g = act[:, 1 * H:2 * H]
            g_g = act[:, 2 * H:3 * H]
            o_g = act[:, 3 * H:4 * H]

            c = f_g * c + i_g * g_g
            h = o_g * jnp.tanh(c)
            h_b = h.astype(bf16)
            if have_next:
                # Fuse next layer's input projection under this layer's recurrence:
                # removes the (T*B, H) intermediate and the T-way concatenate.
                next_slices.append(
                    jnp.dot(h_b, wih_next, preferred_element_type=f32) + bias_next)

        # Final-state writes: exactly once per layer (sublane-aligned, B = 8k).
        hN_ref[l] = h
        cN_ref[l] = c
        proj_slices = next_slices

    # out = fc(relu(out[:, -1]))  — last timestep of last layer == its final h.
    fc_in = jnp.maximum(h, 0.0)
    if fc_as_reduce:
        # O == 1: VPU reduce instead of a wasted MXU pass with a 1-lane result.
        out_ref[...] = (jnp.sum(fc_in * wfc_ref[...], axis=-1, keepdims=True)
                        + bfc_ref[...])
    else:
        out_ref[...] = (jnp.dot(fc_in.astype(wfc_ref.dtype), wfc_ref[...],
                                preferred_element_type=f32) + bfc_ref[...])


def _full_spec(shape):
    nd = len(shape)
    return pl.BlockSpec(shape, lambda: (0,) * nd)


# ----------------------------------------------------------------------------
# Wrapper
# ----------------------------------------------------------------------------
def lstm_net_forward(params, x, h):
    """Pallas forward matching LSTMNet.forward(x, h).

    x: (B, T, input_dim) batch_first (PyTorch convention).
    h: tuple (h0, c0), each (n_layers, B, hidden_dim).
    Returns (out (B, output_dim), (h_n, c_n)).
    """
    h0_all, c0_all = h
    n_layers = len(params["lstm"])
    B, T, I = x.shape
    H = h0_all.shape[-1]
    O = params["fc"]["w_t"].shape[-1]
    f32 = jnp.float32
    bf16 = jnp.bfloat16

    # Pad batch to a sublane multiple so every per-timestep row slice and
    # final-state store is (8,128)-tile aligned.  Padded rows are zero and get
    # sliced off below.
    B_pad = max(8, ((B + 7) // 8) * 8)
    pad_b = B_pad - B
    x_p = jnp.pad(x, ((0, pad_b), (0, 0), (0, 0)))
    h0_p = jnp.pad(h0_all, ((0, 0), (0, pad_b), (0, 0)))
    c0_p = jnp.pad(c0_all, ((0, 0), (0, pad_b), (0, 0)))

    # One tiny XLA transpose to time-major rows; bf16 MXU operand.
    x2d = jnp.transpose(x_p, (1, 0, 2)).reshape(T * B_pad, I).astype(bf16)

    weight_args = []
    for lp in params["lstm"]:
        weight_args += [lp["wih_t"].astype(bf16),     # (in_dim, 4H) bf16
                        lp["whh_t"].astype(bf16),     # (H, 4H)      bf16
                        lp["bias"]]                   # (1, 4H)      f32
    fc_as_reduce = (O == 1)
    if fc_as_reduce:
        wfc = params["fc"]["w_t"].T.astype(f32)       # (1, H)  VPU operand
    else:
        wfc = params["fc"]["w_t"].astype(bf16)        # (H, O)  MXU operand
    weight_args += [wfc, params["fc"]["b"]]

    in_specs = [
        _full_spec((T * B_pad, I)),
        _full_spec((n_layers, B_pad, H)),
        _full_spec((n_layers, B_pad, H)),
    ] + [_full_spec(w.shape) for w in weight_args]

    out_specs = (
        _full_spec((B_pad, O)),
        _full_spec((n_layers, B_pad, H)),
        _full_spec((n_layers, B_pad, H)),
    )

    kernel = functools.partial(_lstm_net_kernel, n_layers, T, B_pad, H, fc_as_reduce)

    out, h_n, c_n = pl.pallas_call(
        kernel,
        out_shape=(
            jax.ShapeDtypeStruct((B_pad, O), f32),
            jax.ShapeDtypeStruct((n_layers, B_pad, H), f32),
            jax.ShapeDtypeStruct((n_layers, B_pad, H), f32),
        ),
        in_specs=in_specs,
        out_specs=out_specs,
    )(x2d, h0_p, c0_p, *weight_args)

    # Slice padded batch rows back out.
    return out[:B], (h_n[:, :B], c_n[:, :B])


# ----------------------------------------------------------------------------
# Deterministic parameter init (PyTorch-style uniform(-1/sqrt(H), 1/sqrt(H)))
# ----------------------------------------------------------------------------
def init_params(key, input_dim, hidden_dim, output_dim, n_layers):
    bound = 1.0 / math.sqrt(hidden_dim)
    params = {"lstm": []}
    for l in range(n_layers):
        in_dim = input_dim if l == 0 else hidden_dim
        key, k1, k2, k3, k4 = jax.random.split(key, 5)
        w_ih = jax.random.uniform(k1, (4 * hidden_dim, in_dim), jnp.float32, -bound, bound)
        w_hh = jax.random.uniform(k2, (4 * hidden_dim, hidden_dim), jnp.float32, -bound, bound)
        b_ih = jax.random.uniform(k3, (4 * hidden_dim,), jnp.float32, -bound, bound)
        b_hh = jax.random.uniform(k4, (4 * hidden_dim,), jnp.float32, -bound, bound)
        params["lstm"].append({
            "wih_t": w_ih.T,                               # (in_dim, 4H)
            "whh_t": w_hh.T,                               # (H, 4H)
            "bias": (b_ih + b_hh).reshape(1, 4 * hidden_dim),
        })
    key, k1, k2 = jax.random.split(key, 3)
    w_fc = jax.random.uniform(k1, (output_dim, hidden_dim), jnp.float32, -bound, bound)
    b_fc = jax.random.uniform(k2, (output_dim,), jnp.float32, -bound, bound)
    params["fc"] = {"w_t": w_fc.T, "b": b_fc.reshape(1, output_dim)}
    return params


# ----------------------------------------------------------------------------
# Pure-JAX reference (f32, for correctness check)
# ----------------------------------------------------------------------------
def lstm_net_reference(params, x, h):
    h0_all, c0_all = h
    B, T, _ = x.shape
    layer_in = x
    h_finals, c_finals = [], []
    for l, lp in enumerate(params["lstm"]):
        H = lp["whh_t"].shape[0]
        h_t, c_t = h0_all[l], c0_all[l]
        outs = []
        for t in range(T):
            gates = layer_in[:, t] @ lp["wih_t"] + h_t @ lp["whh_t"] + lp["bias"]
            i_g = jax.nn.sigmoid(gates[:, 0 * H:1 * H])
            f_g = jax.nn.sigmoid(gates[:, 1 * H:2 * H])
            g_g = jnp.tanh(gates[:, 2 * H:3 * H])
            o_g = jax.nn.sigmoid(gates[:, 3 * H:4 * H])
            c_t = f_g * c_t + i_g * g_g
            h_t = o_g * jnp.tanh(c_t)
            outs.append(h_t)
        layer_in = jnp.stack(outs, axis=1)
        h_finals.append(h_t)
        c_finals.append(c_t)
    out = jnp.maximum(layer_in[:, -1], 0.0) @ params["fc"]["w_t"] + params["fc"]["b"]
    return out, (jnp.stack(h_finals), jnp.stack(c_finals))


# ----------------------------------------------------------------------------
if __name__ == "__main__":
    INPUT_DIM, HIDDEN_DIM, OUTPUT_DIM, N_LAYERS = 4, 32, 1, 2
    BATCH, SEQ = 2, 8

    key = jax.random.PRNGKey(0)
    key, pk, xk = jax.random.split(key, 3)
    params = init_params(pk, INPUT_DIM, HIDDEN_DIM, OUTPUT_DIM, N_LAYERS)

    x = jax.random.normal(xk, (BATCH, SEQ, INPUT_DIM), jnp.float32)
    h0 = jnp.zeros((N_LAYERS, BATCH, HIDDEN_DIM), jnp.float32)   # init_hidden()
    c0 = jnp.zeros((N_LAYERS, BATCH, HIDDEN_DIM), jnp.float32)

    out, (h_n, c_n) = lstm_net_forward(params, x, (h0, c0))
    out = jax.block_until_ready(out)
    h_n = jax.block_until_ready(h_n)
    c_n = jax.block_until_ready(c_n)

    ref_out, (ref_h, ref_c) = lstm_net_reference(params, x, (h0, c0))
    # bf16 MXU operands (f32 accumulation) -> loosened tolerance vs. the f32
    # reference; observed error is O(1e-3), bound is comfortably above that.
    assert jnp.allclose(out, ref_out, rtol=2e-2, atol=2e-2)
    assert jnp.allclose(h_n, ref_h, rtol=2e-2, atol=2e-2)
    assert jnp.allclose(c_n, ref_c, rtol=2e-2, atol=2e-2)

    print("KERNEL_OK")
</pallas_src>

<mosaic_0001>
module attributes {stable_mosaic.version = 11 : i64} {
  func.func @_lstm_net_kernel(%arg0: memref<64x4xbf16, #tpu.memory_space<vmem>>, %arg1: memref<2x8x32xf32, #tpu.memory_space<vmem>>, %arg2: memref<2x8x32xf32, #tpu.memory_space<vmem>>, %arg3: memref<4x128xbf16, #tpu.memory_space<vmem>>, %arg4: memref<32x128xbf16, #tpu.memory_space<vmem>>, %arg5: memref<1x128xf32, #tpu.memory_space<vmem>>, %arg6: memref<32x128xbf16, #tpu.memory_space<vmem>>, %arg7: memref<32x128xbf16, #tpu.memory_space<vmem>>, %arg8: memref<1x128xf32, #tpu.memory_space<vmem>>, %arg9: memref<1x32xf32, #tpu.memory_space<vmem>>, %arg10: memref<1x1xf32, #tpu.memory_space<vmem>>, %arg11: memref<8x1xf32, #tpu.memory_space<vmem>>, %arg12: memref<2x8x32xf32, #tpu.memory_space<vmem>>, %arg13: memref<2x8x32xf32, #tpu.memory_space<vmem>>) attributes {dimension_semantics = [], scalar_prefetch = 0 : i64, scratch_operands = 0 : i64, tpu.core_type = #tpu.core_type<tc>} {
    %0 = tpu.iota {dimensions = array<i32: 1>} : vector<8x128xi32>
    %c64_i32 = arith.constant 64 : i32
    %1 = vector.broadcast %c64_i32 : i32 to vector<8x128xi32>
    %2 = arith.cmpi sge, %0, %1 : vector<8x128xi32>
    %c96_i32 = arith.constant 96 : i32
    %3 = vector.broadcast %c96_i32 : i32 to vector<8x128xi32>
    %4 = arith.cmpi slt, %0, %3 : vector<8x128xi32>
    %5 = arith.andi %2, %4 : vector<8x128xi1>
    %cst = arith.constant 1.000000e+00 : f32
    %cst_0 = arith.constant 5.000000e-01 : f32
    %6 = vector.broadcast %cst : f32 to vector<8x128xf32>
    %7 = vector.broadcast %cst_0 : f32 to vector<8x128xf32>
    %8 = arith.select %5, %6, %7 : vector<8x128xi1>, vector<8x128xf32>
    %cst_1 = arith.constant 0.000000e+00 : f32
    %cst_2 = arith.constant 5.000000e-01 : f32
    %9 = vector.broadcast %cst_1 : f32 to vector<8x128xf32>
    %10 = vector.broadcast %cst_2 : f32 to vector<8x128xf32>
    %11 = arith.select %5, %9, %10 : vector<8x128xi1>, vector<8x128xf32>
    %c0 = arith.constant 0 : index
    %c0_3 = arith.constant 0 : index
    %12 = vector.load %arg0[%c0, %c0_3] : memref<64x4xbf16, #tpu.memory_space<vmem>>, vector<64x4xbf16>
    %c0_4 = arith.constant 0 : index
    %c0_5 = arith.constant 0 : index
    %13 = vector.load %arg3[%c0_4, %c0_5] : memref<4x128xbf16, #tpu.memory_space<vmem>>, vector<4x128xbf16>
    %cst_6 = arith.constant dense<0.000000e+00> : vector<64x128xf32>
    %14 = tpu.matmul %12, %13, %cst_6 {dimension_numbers = #tpu.dot_dimension_numbers<[1], [0], [0], [1], [0, 0, 1, 1], [], []>} : vector<64x4xbf16>, vector<4x128xbf16>, vector<64x128xf32> -> vector<64x128xf32>
    %c0_7 = arith.constant 0 : index
    %c0_8 = arith.constant 0 : index
    %15 = vector.load %arg5[%c0_7, %c0_8] : memref<1x128xf32, #tpu.memory_space<vmem>>, vector<1x128xf32>
    %16 = vector.broadcast %15 : vector<1x128xf32> to vector<64x128xf32>
    %17 = arith.addf %14, %16 : vector<64x128xf32>
    %18 = vector.extract_strided_slice %17 {offsets = [0, 0], sizes = [8, 128], strides = [1, 1]} : vector<64x128xf32> to vector<8x128xf32>
    %19 = vector.extract_strided_slice %17 {offsets = [8, 0], sizes = [8, 128], strides = [1, 1]} : vector<64x128xf32> to vector<8x128xf32>
    %20 = vector.extract_strided_slice %17 {offsets = [16, 0], sizes = [8, 128], strides = [1, 1]} : vector<64x128xf32> to vector<8x128xf32>
    %21 = vector.extract_strided_slice %17 {offsets = [24, 0], sizes = [8, 128], strides = [1, 1]} : vector<64x128xf32> to vector<8x128xf32>
    %22 = vector.extract_strided_slice %17 {offsets = [32, 0], sizes = [8, 128], strides = [1, 1]} : vector<64x128xf32> to vector<8x128xf32>
    %23 = vector.extract_strided_slice %17 {offsets = [40, 0], sizes = [8, 128], strides = [1, 1]} : vector<64x128xf32> to vector<8x128xf32>
    %24 = vector.extract_strided_slice %17 {offsets = [48, 0], sizes = [8, 128], strides = [1, 1]} : vector<64x128xf32> to vector<8x128xf32>
    %25 = vector.extract_strided_slice %17 {offsets = [56, 0], sizes = [8, 128], strides = [1, 1]} : vector<64x128xf32> to vector<8x128xf32>
    %c0_9 = arith.constant 0 : index
    %c0_10 = arith.constant 0 : index
    %26 = vector.load %arg4[%c0_9, %c0_10] : memref<32x128xbf16, #tpu.memory_space<vmem>>, vector<32x128xbf16>
    %c0_11 = arith.constant 0 : index
    %c0_12 = arith.constant 0 : index
    %27 = vector.load %arg6[%c0_11, %c0_12] : memref<32x128xbf16, #tpu.memory_space<vmem>>, vector<32x128xbf16>
    %c0_13 = arith.constant 0 : index
    %c0_14 = arith.constant 0 : index
    %28 = vector.load %arg8[%c0_13, %c0_14] : memref<1x128xf32, #tpu.memory_space<vmem>>, vector<1x128xf32>
    %c0_15 = arith.constant 0 : index
    %c0_16 = arith.constant 0 : index
    %c0_17 = arith.constant 0 : index
    %29 = vector.load %arg1[%c0_15, %c0_16, %c0_17] : memref<2x8x32xf32, #tpu.memory_space<vmem>>, vector<1x8x32xf32>
    %30 = vector.shape_cast %29 : vector<1x8x32xf32> to vector<8x32xf32>
    %c0_18 = arith.constant 0 : index
    %c0_19 = arith.constant 0 : index
    %c0_20 = arith.constant 0 : index
    %31 = vector.load %arg2[%c0_18, %c0_19, %c0_20] : memref<2x8x32xf32, #tpu.memory_space<vmem>>, vector<1x8x32xf32>
    %32 = vector.shape_cast %31 : vector<1x8x32xf32> to vector<8x32xf32>
    %33 = arith.truncf %30 : vector<8x32xf32> to vector<8x32xbf16>
    %cst_21 = arith.constant dense<0.000000e+00> : vector<8x128xf32>
    %34 = tpu.matmul %33, %26, %cst_21 {dimension_numbers = #tpu.dot_dimension_numbers<[1], [0], [0], [1], [0, 0, 1, 1], [], []>} : vector<8x32xbf16>, vector<32x128xbf16>, vector<8x128xf32> -> vector<8x128xf32>
    %35 = arith.addf %18, %34 : vector<8x128xf32>
    %36 = arith.mulf %35, %8 : vector<8x128xf32>
    %37 = math.tanh %36 : vector<8x128xf32>
    %38 = arith.mulf %37, %8 : vector<8x128xf32>
    %39 = arith.addf %38, %11 : vector<8x128xf32>
    %40 = vector.extract_strided_slice %39 {offsets = [0, 0], sizes = [8, 32], strides = [1, 1]} : vector<8x128xf32> to vector<8x32xf32>
    %41 = vector.extract_strided_slice %39 {offsets = [0, 32], sizes = [8, 32], strides = [1, 1]} : vector<8x128xf32> to vector<8x32xf32>
    %42 = vector.extract_strided_slice %39 {offsets = [0, 64], sizes = [8, 32], strides = [1, 1]} : vector<8x128xf32> to vector<8x32xf32>
    %43 = vector.extract_strided_slice %39 {offsets = [0, 96], sizes = [8, 32], strides = [1, 1]} : vector<8x128xf32> to vector<8x32xf32>
    %44 = arith.mulf %41, %32 : vector<8x32xf32>
    %45 = arith.mulf %40, %42 : vector<8x32xf32>
    %46 = arith.addf %44, %45 : vector<8x32xf32>
    %47 = math.tanh %46 : vector<8x32xf32>
    %48 = arith.mulf %43, %47 : vector<8x32xf32>
    %49 = arith.truncf %48 : vector<8x32xf32> to vector<8x32xbf16>
    %cst_22 = arith.constant dense<0.000000e+00> : vector<8x128xf32>
    %50 = tpu.matmul %49, %27, %cst_22 {dimension_numbers = #tpu.dot_dimension_numbers<[1], [0], [0], [1], [0, 0, 1, 1], [], []>} : vector<8x32xbf16>, vector<32x128xbf16>, vector<8x128xf32> -> vector<8x128xf32>
    %51 = vector.broadcast %28 : vector<1x128xf32> to vector<8x128xf32>
    %52 = arith.addf %50, %51 : vector<8x128xf32>
    %cst_23 = arith.constant dense<0.000000e+00> : vector<8x128xf32>
    %53 = tpu.matmul %49, %26, %cst_23 {dimension_numbers = #tpu.dot_dimension_numbers<[1], [0], [0], [1], [0, 0, 1, 1], [], []>} : vector<8x32xbf16>, vector<32x128xbf16>, vector<8x128xf32> -> vector<8x128xf32>
    %54 = arith.addf %19, %53 : vector<8x128xf32>
    %55 = arith.mulf %54, %8 : vector<8x128xf32>
    %56 = math.tanh %55 : vector<8x128xf32>
    %57 = arith.mulf %56, %8 : vector<8x128xf32>
    %58 = arith.addf %57, %11 : vector<8x128xf32>
    %59 = vector.extract_strided_slice %58 {offsets = [0, 0], sizes = [8, 32], strides = [1, 1]} : vector<8x128xf32> to vector<8x32xf32>
    %60 = vector.extract_strided_slice %58 {offsets = [0, 32], sizes = [8, 32], strides = [1, 1]} : vector<8x128xf32> to vector<8x32xf32>
    %61 = vector.extract_strided_slice %58 {offsets = [0, 64], sizes = [8, 32], strides = [1, 1]} : vector<8x128xf32> to vector<8x32xf32>
    %62 = vector.extract_strided_slice %58 {offsets = [0, 96], sizes = [8, 32], strides = [1, 1]} : vector<8x128xf32> to vector<8x32xf32>
    %63 = arith.mulf %60, %46 : vector<8x32xf32>
    %64 = arith.mulf %59, %61 : vector<8x32xf32>
    %65 = arith.addf %63, %64 : vector<8x32xf32>
    %66 = math.tanh %65 : vector<8x32xf32>
    %67 = arith.mulf %62, %66 : vector<8x32xf32>
    %68 = arith.truncf %67 : vector<8x32xf32> to vector<8x32xbf16>
    %cst_24 = arith.constant dense<0.000000e+00> : vector<8x128xf32>
    %69 = tpu.matmul %68, %27, %cst_24 {dimension_numbers = #tpu.dot_dimension_numbers<[1], [0], [0], [1], [0, 0, 1, 1], [], []>} : vector<8x32xbf16>, vector<32x128xbf16>, vector<8x128xf32> -> vector<8x128xf32>
    %70 = vector.broadcast %28 : vector<1x128xf32> to vector<8x128xf32>
    %71 = arith.addf %69, %70 : vector<8x128xf32>
    %cst_25 = arith.constant dense<0.000000e+00> : vector<8x128xf32>
    %72 = tpu.matmul %68, %26, %cst_25 {dimension_numbers = #tpu.dot_dimension_numbers<[1], [0], [0], [1], [0, 0, 1, 1], [], []>} : vector<8x32xbf16>, vector<32x128xbf16>, vector<8x128xf32> -> vector<8x128xf32>
    %73 = arith.addf %20, %72 : vector<8x128xf32>
    %74 = arith.mulf %73, %8 : vector<8x128xf32>
    %75 = math.tanh %74 : vector<8x128xf32>
    %76 = arith.mulf %75, %8 : vector<8x128xf32>
    %77 = arith.addf %76, %11 : vector<8x128xf32>
    %78 = vector.extract_strided_slice %77 {offsets = [0, 0], sizes = [8, 32], strides = [1, 1]} : vector<8x128xf32> to vector<8x32xf32>
    %79 = vector.extract_strided_slice %77 {offsets = [0, 32], sizes = [8, 32], strides = [1, 1]} : vector<8x128xf32> to vector<8x32xf32>
    %80 = vector.extract_strided_slice %77 {offsets = [0, 64], sizes = [8, 32], strides = [1, 1]} : vector<8x128xf32> to vector<8x32xf32>
    %81 = vector.extract_strided_slice %77 {offsets = [0, 96], sizes = [8, 32], strides = [1, 1]} : vector<8x128xf32> to vector<8x32xf32>
    %82 = arith.mulf %79, %65 : vector<8x32xf32>
    %83 = arith.mulf %78, %80 : vector<8x32xf32>
    %84 = arith.addf %82, %83 : vector<8x32xf32>
    %85 = math.tanh %84 : vector<8x32xf32>
    %86 = arith.mulf %81, %85 : vector<8x32xf32>
    %87 = arith.truncf %86 : vector<8x32xf32> to vector<8x32xbf16>
    %cst_26 = arith.constant dense<0.000000e+00> : vector<8x128xf32>
    %88 = tpu.matmul %87, %27, %cst_26 {dimension_numbers = #tpu.dot_dimension_numbers<[1], [0], [0], [1], [0, 0, 1, 1], [], []>} : vector<8x32xbf16>, vector<32x128xbf16>, vector<8x128xf32> -> vector<8x128xf32>
    %89 = vector.broadcast %28 : vector<1x128xf32> to vector<8x128xf32>
    %90 = arith.addf %88, %89 : vector<8x128xf32>
    %cst_27 = arith.constant dense<0.000000e+00> : vector<8x128xf32>
    %91 = tpu.matmul %87, %26, %cst_27 {dimension_numbers = #tpu.dot_dimension_numbers<[1], [0], [0], [1], [0, 0, 1, 1], [], []>} : vector<8x32xbf16>, vector<32x128xbf16>, vector<8x128xf32> -> vector<8x128xf32>
    %92 = arith.addf %21, %91 : vector<8x128xf32>
    %93 = arith.mulf %92, %8 : vector<8x128xf32>
    %94 = math.tanh %93 : vector<8x128xf32>
    %95 = arith.mulf %94, %8 : vector<8x128xf32>
    %96 = arith.addf %95, %11 : vector<8x128xf32>
    %97 = vector.extract_strided_slice %96 {offsets = [0, 0], sizes = [8, 32], strides = [1, 1]} : vector<8x128xf32> to vector<8x32xf32>
    %98 = vector.extract_strided_slice %96 {offsets = [0, 32], sizes = [8, 32], strides = [1, 1]} : vector<8x128xf32> to vector<8x32xf32>
    %99 = vector.extract_strided_slice %96 {offsets = [0, 64], sizes = [8, 32], strides = [1, 1]} : vector<8x128xf32> to vector<8x32xf32>
    %100 = vector.extract_strided_slice %96 {offsets = [0, 96], sizes = [8, 32], strides = [1, 1]} : vector<8x128xf32> to vector<8x32xf32>
    %101 = arith.mulf %98, %84 : vector<8x32xf32>
    %102 = arith.mulf %97, %99 : vector<8x32xf32>
    %103 = arith.addf %101, %102 : vector<8x32xf32>
    %104 = math.tanh %103 : vector<8x32xf32>
    %105 = arith.mulf %100, %104 : vector<8x32xf32>
    %106 = arith.truncf %105 : vector<8x32xf32> to vector<8x32xbf16>
    %cst_28 = arith.constant dense<0.000000e+00> : vector<8x128xf32>
    %107 = tpu.matmul %106, %27, %cst_28 {dimension_numbers = #tpu.dot_dimension_numbers<[1], [0], [0], [1], [0, 0, 1, 1], [], []>} : vector<8x32xbf16>, vector<32x128xbf16>, vector<8x128xf32> -> vector<8x128xf32>
    %108 = vector.broadcast %28 : vector<1x128xf32> to vector<8x128xf32>
    %109 = arith.addf %107, %108 : vector<8x128xf32>
    %cst_29 = arith.constant dense<0.000000e+00> : vector<8x128xf32>
    %110 = tpu.matmul %106, %26, %cst_29 {dimension_numbers = #tpu.dot_dimension_numbers<[1], [0], [0], [1], [0, 0, 1, 1], [], []>} : vector<8x32xbf16>, vector<32x128xbf16>, vector<8x128xf32> -> vector<8x128xf32>
    %111 = arith.addf %22, %110 : vector<8x128xf32>
    %112 = arith.mulf %111, %8 : vector<8x128xf32>
    %113 = math.tanh %112 : vector<8x128xf32>
    %114 = arith.mulf %113, %8 : vector<8x128xf32>
    %115 = arith.addf %114, %11 : vector<8x128xf32>
    %116 = vector.extract_strided_slice %115 {offsets = [0, 0], sizes = [8, 32], strides = [1, 1]} : vector<8x128xf32> to vector<8x32xf32>
    %117 = vector.extract_strided_slice %115 {offsets = [0, 32], sizes = [8, 32], strides = [1, 1]} : vector<8x128xf32> to vector<8x32xf32>
    %118 = vector.extract_strided_slice %115 {offsets = [0, 64], sizes = [8, 32], strides = [1, 1]} : vector<8x128xf32> to vector<8x32xf32>
    %119 = vector.extract_strided_slice %115 {offsets = [0, 96], sizes = [8, 32], strides = [1, 1]} : vector<8x128xf32> to vector<8x32xf32>
    %120 = arith.mulf %117, %103 : vector<8x32xf32>
    %121 = arith.mulf %116, %118 : vector<8x32xf32>
    %122 = arith.addf %120, %121 : vector<8x32xf32>
    %123 = math.tanh %122 : vector<8x32xf32>
    %124 = arith.mulf %119, %123 : vector<8x32xf32>
    %125 = arith.truncf %124 : vector<8x32xf32> to vector<8x32xbf16>
    %cst_30 = arith.constant dense<0.000000e+00> : vector<8x128xf32>
    %126 = tpu.matmul %125, %27, %cst_30 {dimension_numbers = #tpu.dot_dimension_numbers<[1], [0], [0], [1], [0, 0, 1, 1], [], []>} : vector<8x32xbf16>, vector<32x128xbf16>, vector<8x128xf32> -> vector<8x128xf32>
    %127 = vector.broadcast %28 : vector<1x128xf32> to vector<8x128xf32>
    %128 = arith.addf %126, %127 : vector<8x128xf32>
    %cst_31 = arith.constant dense<0.000000e+00> : vector<8x128xf32>
    %129 = tpu.matmul %125, %26, %cst_31 {dimension_numbers = #tpu.dot_dimension_numbers<[1], [0], [0], [1], [0, 0, 1, 1], [], []>} : vector<8x32xbf16>, vector<32x128xbf16>, vector<8x128xf32> -> vector<8x128xf32>
    %130 = arith.addf %23, %129 : vector<8x128xf32>
    %131 = arith.mulf %130, %8 : vector<8x128xf32>
    %132 = math.tanh %131 : vector<8x128xf32>
    %133 = arith.mulf %132, %8 : vector<8x128xf32>
    %134 = arith.addf %133, %11 : vector<8x128xf32>
    %135 = vector.extract_strided_slice %134 {offsets = [0, 0], sizes = [8, 32], strides = [1, 1]} : vector<8x128xf32> to vector<8x32xf32>
    %136 = vector.extract_strided_slice %134 {offsets = [0, 32], sizes = [8, 32], strides = [1, 1]} : vector<8x128xf32> to vector<8x32xf32>
    %137 = vector.extract_strided_slice %134 {offsets = [0, 64], sizes = [8, 32], strides = [1, 1]} : vector<8x128xf32> to vector<8x32xf32>
    %138 = vector.extract_strided_slice %134 {offsets = [0, 96], sizes = [8, 32], strides = [1, 1]} : vector<8x128xf32> to vector<8x32xf32>
    %139 = arith.mulf %136, %122 : vector<8x32xf32>
    %140 = arith.mulf %135, %137 : vector<8x32xf32>
    %141 = arith.addf %139, %140 : vector<8x32xf32>
    %142 = math.tanh %141 : vector<8x32xf32>
    %143 = arith.mulf %138, %142 : vector<8x32xf32>
    %144 = arith.truncf %143 : vector<8x32xf32> to vector<8x32xbf16>
    %cst_32 = arith.constant dense<0.000000e+00> : vector<8x128xf32>
    %145 = tpu.matmul %144, %27, %cst_32 {dimension_numbers = #tpu.dot_dimension_numbers<[1], [0], [0], [1], [0, 0, 1, 1], [], []>} : vector<8x32xbf16>, vector<32x128xbf16>, vector<8x128xf32> -> vector<8x128xf32>
    %146 = vector.broadcast %28 : vector<1x128xf32> to vector<8x128xf32>
    %147 = arith.addf %145, %146 : vector<8x128xf32>
    %cst_33 = arith.constant dense<0.000000e+00> : vector<8x128xf32>
    %148 = tpu.matmul %144, %26, %cst_33 {dimension_numbers = #tpu.dot_dimension_numbers<[1], [0], [0], [1], [0, 0, 1, 1], [], []>} : vector<8x32xbf16>, vector<32x128xbf16>, vector<8x128xf32> -> vector<8x128xf32>
    %149 = arith.addf %24, %148 : vector<8x128xf32>
    %150 = arith.mulf %149, %8 : vector<8x128xf32>
    %151 = math.tanh %150 : vector<8x128xf32>
    %152 = arith.mulf %151, %8 : vector<8x128xf32>
    %153 = arith.addf %152, %11 : vector<8x128xf32>
    %154 = vector.extract_strided_slice %153 {offsets = [0, 0], sizes = [8, 32], strides = [1, 1]} : vector<8x128xf32> to vector<8x32xf32>
    %155 = vector.extract_strided_slice %153 {offsets = [0, 32], sizes = [8, 32], strides = [1, 1]} : vector<8x128xf32> to vector<8x32xf32>
    %156 = vector.extract_strided_slice %153 {offsets = [0, 64], sizes = [8, 32], strides = [1, 1]} : vector<8x128xf32> to vector<8x32xf32>
    %157 = vector.extract_strided_slice %153 {offsets = [0, 96], sizes = [8, 32], strides = [1, 1]} : vector<8x128xf32> to vector<8x32xf32>
    %158 = arith.mulf %155, %141 : vector<8x32xf32>
    %159 = arith.mulf %154, %156 : vector<8x32xf32>
    %160 = arith.addf %158, %159 : vector<8x32xf32>
    %161 = math.tanh %160 : vector<8x32xf32>
    %162 = arith.mulf %157, %161 : vector<8x32xf32>
    %163 = arith.truncf %162 : vector<8x32xf32> to vector<8x32xbf16>
    %cst_34 = arith.constant dense<0.000000e+00> : vector<8x128xf32>
    %164 = tpu.matmul %163, %27, %cst_34 {dimension_numbers = #tpu.dot_dimension_numbers<[1], [0], [0], [1], [0, 0, 1, 1], [], []>} : vector<8x32xbf16>, vector<32x128xbf16>, vector<8x128xf32> -> vector<8x128xf32>
    %165 = vector.broadcast %28 : vector<1x128xf32> to vector<8x128xf32>
    %166 = arith.addf %164, %165 : vector<8x128xf32>
    %cst_35 = arith.constant dense<0.000000e+00> : vector<8x128xf32>
    %167 = tpu.matmul %163, %26, %cst_35 {dimension_numbers = #tpu.dot_dimension_numbers<[1], [0], [0], [1], [0, 0, 1, 1], [], []>} : vector<8x32xbf16>, vector<32x128xbf16>, vector<8x128xf32> -> vector<8x128xf32>
    %168 = arith.addf %25, %167 : vector<8x128xf32>
    %169 = arith.mulf %168, %8 : vector<8x128xf32>
    %170 = math.tanh %169 : vector<8x128xf32>
    %171 = arith.mulf %170, %8 : vector<8x128xf32>
    %172 = arith.addf %171, %11 : vector<8x128xf32>
    %173 = vector.extract_strided_slice %172 {offsets = [0, 0], sizes = [8, 32], strides = [1, 1]} : vector<8x128xf32> to vector<8x32xf32>
    %174 = vector.extract_strided_slice %172 {offsets = [0, 32], sizes = [8, 32], strides = [1, 1]} : vector<8x128xf32> to vector<8x32xf32>
    %175 = vector.extract_strided_slice %172 {offsets = [0, 64], sizes = [8, 32], strides = [1, 1]} : vector<8x128xf32> to vector<8x32xf32>
    %176 = vector.extract_strided_slice %172 {offsets = [0, 96], sizes = [8, 32], strides = [1, 1]} : vector<8x128xf32> to vector<8x32xf32>
    %177 = arith.mulf %174, %160 : vector<8x32xf32>
    %178 = arith.mulf %173, %175 : vector<8x32xf32>
    %179 = arith.addf %177, %178 : vector<8x32xf32>
    %180 = math.tanh %179 : vector<8x32xf32>
    %181 = arith.mulf %176, %180 : vector<8x32xf32>
    %182 = arith.truncf %181 : vector<8x32xf32> to vector<8x32xbf16>
    %cst_36 = arith.constant dense<0.000000e+00> : vector<8x128xf32>
    %183 = tpu.matmul %182, %27, %cst_36 {dimension_numbers = #tpu.dot_dimension_numbers<[1], [0], [0], [1], [0, 0, 1, 1], [], []>} : vector<8x32xbf16>, vector<32x128xbf16>, vector<8x128xf32> -> vector<8x128xf32>
    %184 = vector.broadcast %28 : vector<1x128xf32> to vector<8x128xf32>
    %185 = arith.addf %183, %184 : vector<8x128xf32>
    %c0_37 = arith.constant 0 : index
    %c0_38 = arith.constant 0 : index
    %c0_39 = arith.constant 0 : index
    %186 = vector.load %arg12[%c0_37, %c0_38, %c0_39] : memref<2x8x32xf32, #tpu.memory_space<vmem>>, vector<1x8x32xf32>
    %187 = vector.shape_cast %186 : vector<1x8x32xf32> to vector<8x32xf32>
    %188 = vector.shape_cast %181 : vector<8x32xf32> to vector<1x8x32xf32>
    tpu.vector_store %arg12[%c0_37, %c0_38, %c0_39], %188 {strides = array<i32>} : memref<2x8x32xf32, #tpu.memory_space<vmem>>, vector<1x8x32xf32>,
    %c0_40 = arith.constant 0 : index
    %c0_41 = arith.constant 0 : index
    %c0_42 = arith.constant 0 : index
    %189 = vector.load %arg13[%c0_40, %c0_41, %c0_42] : memref<2x8x32xf32, #tpu.memory_space<vmem>>, vector<1x8x32xf32>
    %190 = vector.shape_cast %189 : vector<1x8x32xf32> to vector<8x32xf32>
    %191 = vector.shape_cast %179 : vector<8x32xf32> to vector<1x8x32xf32>
    tpu.vector_store %arg13[%c0_40, %c0_41, %c0_42], %191 {strides = array<i32>} : memref<2x8x32xf32, #tpu.memory_space<vmem>>, vector<1x8x32xf32>,
    %c0_43 = arith.constant 0 : index
    %c0_44 = arith.constant 0 : index
    %192 = vector.load %arg7[%c0_43, %c0_44] : memref<32x128xbf16, #tpu.memory_space<vmem>>, vector<32x128xbf16>
    %c1 = arith.constant 1 : index
    %c0_45 = arith.constant 0 : index
    %c0_46 = arith.constant 0 : index
    %193 = vector.load %arg1[%c1, %c0_45, %c0_46] : memref<2x8x32xf32, #tpu.memory_space<vmem>>, vector<1x8x32xf32>
    %194 = vector.shape_cast %193 : vector<1x8x32xf32> to vector<8x32xf32>
    %c1_47 = arith.constant 1 : index
    %c0_48 = arith.constant 0 : index
    %c0_49 = arith.constant 0 : index
    %195 = vector.load %arg2[%c1_47, %c0_48, %c0_49] : memref<2x8x32xf32, #tpu.memory_space<vmem>>, vector<1x8x32xf32>
    %196 = vector.shape_cast %195 : vector<1x8x32xf32> to vector<8x32xf32>
    %197 = arith.truncf %194 : vector<8x32xf32> to vector<8x32xbf16>
    %cst_50 = arith.constant dense<0.000000e+00> : vector<8x128xf32>
    %198 = tpu.matmul %197, %192, %cst_50 {dimension_numbers = #tpu.dot_dimension_numbers<[1], [0], [0], [1], [0, 0, 1, 1], [], []>} : vector<8x32xbf16>, vector<32x128xbf16>, vector<8x128xf32> -> vector<8x128xf32>
    %199 = arith.addf %52, %198 : vector<8x128xf32>
    %200 = arith.mulf %199, %8 : vector<8x128xf32>
    %201 = math.tanh %200 : vector<8x128xf32>
    %202 = arith.mulf %201, %8 : vector<8x128xf32>
    %203 = arith.addf %202, %11 : vector<8x128xf32>
    %204 = vector.extract_strided_slice %203 {offsets = [0, 0], sizes = [8, 32], strides = [1, 1]} : vector<8x128xf32> to vector<8x32xf32>
    %205 = vector.extract_strided_slice %203 {offsets = [0, 32], sizes = [8, 32], strides = [1, 1]} : vector<8x128xf32> to vector<8x32xf32>
    %206 = vector.extract_strided_slice %203 {offsets = [0, 64], sizes = [8, 32], strides = [1, 1]} : vector<8x128xf32> to vector<8x32xf32>
    %207 = vector.extract_strided_slice %203 {offsets = [0, 96], sizes = [8, 32], strides = [1, 1]} : vector<8x128xf32> to vector<8x32xf32>
    %208 = arith.mulf %205, %196 : vector<8x32xf32>
    %209 = arith.mulf %204, %206 : vector<8x32xf32>
    %210 = arith.addf %208, %209 : vector<8x32xf32>
    %211 = math.tanh %210 : vector<8x32xf32>
    %212 = arith.mulf %207, %211 : vector<8x32xf32>
    %213 = arith.truncf %212 : vector<8x32xf32> to vector<8x32xbf16>
    %cst_51 = arith.constant dense<0.000000e+00> : vector<8x128xf32>
    %214 = tpu.matmul %213, %192, %cst_51 {dimension_numbers = #tpu.dot_dimension_numbers<[1], [0], [0], [1], [0, 0, 1, 1], [], []>} : vector<8x32xbf16>, vector<32x128xbf16>, vector<8x128xf32> -> vector<8x128xf32>
    %215 = arith.addf %71, %214 : vector<8x128xf32>
    %216 = arith.mulf %215, %8 : vector<8x128xf32>
    %217 = math.tanh %216 : vector<8x128xf32>
    %218 = arith.mulf %217, %8 : vector<8x128xf32>
    %219 = arith.addf %218, %11 : vector<8x128xf32>
    %220 = vector.extract_strided_slice %219 {offsets = [0, 0], sizes = [8, 32], strides = [1, 1]} : vector<8x128xf32> to vector<8x32xf32>
    %221 = vector.extract_strided_slice %219 {offsets = [0, 32], sizes = [8, 32], strides = [1, 1]} : vector<8x128xf32> to vector<8x32xf32>
    %222 = vector.extract_strided_slice %219 {offsets = [0, 64], sizes = [8, 32], strides = [1, 1]} : vector<8x128xf32> to vector<8x32xf32>
    %223 = vector.extract_strided_slice %219 {offsets = [0, 96], sizes = [8, 32], strides = [1, 1]} : vector<8x128xf32> to vector<8x32xf32>
    %224 = arith.mulf %221, %210 : vector<8x32xf32>
    %225 = arith.mulf %220, %222 : vector<8x32xf32>
    %226 = arith.addf %224, %225 : vector<8x32xf32>
    %227 = math.tanh %226 : vector<8x32xf32>
    %228 = arith.mulf %223, %227 : vector<8x32xf32>
    %229 = arith.truncf %228 : vector<8x32xf32> to vector<8x32xbf16>
    %cst_52 = arith.constant dense<0.000000e+00> : vector<8x128xf32>
    %230 = tpu.matmul %229, %192, %cst_52 {dimension_numbers = #tpu.dot_dimension_numbers<[1], [0], [0], [1], [0, 0, 1, 1], [], []>} : vector<8x32xbf16>, vector<32x128xbf16>, vector<8x128xf32> -> vector<8x128xf32>
    %231 = arith.addf %90, %230 : vector<8x128xf32>
    %232 = arith.mulf %231, %8 : vector<8x128xf32>
    %233 = math.tanh %232 : vector<8x128xf32>
    %234 = arith.mulf %233, %8 : vector<8x128xf32>
    %235 = arith.addf %234, %11 : vector<8x128xf32>
    %236 = vector.extract_strided_slice %235 {offsets = [0, 0], sizes = [8, 32], strides = [1, 1]} : vector<8x128xf32> to vector<8x32xf32>
    %237 = vector.extract_strided_slice %235 {offsets = [0, 32], sizes = [8, 32], strides = [1, 1]} : vector<8x128xf32> to vector<8x32xf32>
    %238 = vector.extract_strided_slice %235 {offsets = [0, 64], sizes = [8, 32], strides = [1, 1]} : vector<8x128xf32> to vector<8x32xf32>
    %239 = vector.extract_strided_slice %235 {offsets = [0, 96], sizes = [8, 32], strides = [1, 1]} : vector<8x128xf32> to vector<8x32xf32>
    %240 = arith.mulf %237, %226 : vector<8x32xf32>
    %241 = arith.mulf %236, %238 : vector<8x32xf32>
    %242 = arith.addf %240, %241 : vector<8x32xf32>
    %243 = math.tanh %242 : vector<8x32xf32>
    %244 = arith.mulf %239, %243 : vector<8x32xf32>
    %245 = arith.truncf %244 : vector<8x32xf32> to vector<8x32xbf16>
    %cst_53 = arith.constant dense<0.000000e+00> : vector<8x128xf32>
    %246 = tpu.matmul %245, %192, %cst_53 {dimension_numbers = #tpu.dot_dimension_numbers<[1], [0], [0], [1], [0, 0, 1, 1], [], []>} : vector<8x32xbf16>, vector<32x128xbf16>, vector<8x128xf32> -> vector<8x128xf32>
    %247 = arith.addf %109, %246 : vector<8x128xf32>
    %248 = arith.mulf %247, %8 : vector<8x128xf32>
    %249 = math.tanh %248 : vector<8x128xf32>
    %250 = arith.mulf %249, %8 : vector<8x128xf32>
    %251 = arith.addf %250, %11 : vector<8x128xf32>
    %252 = vector.extract_strided_slice %251 {offsets = [0, 0], sizes = [8, 32], strides = [1, 1]} : vector<8x128xf32> to vector<8x32xf32>
    %253 = vector.extract_strided_slice %251 {offsets = [0, 32], sizes = [8, 32], strides = [1, 1]} : vector<8x128xf32> to vector<8x32xf32>
    %254 = vector.extract_strided_slice %251 {offsets = [0, 64], sizes = [8, 32], strides = [1, 1]} : vector<8x128xf32> to vector<8x32xf32>
    %255 = vector.extract_strided_slice %251 {offsets = [0, 96], sizes = [8, 32], strides = [1, 1]} : vector<8x128xf32> to vector<8x32xf32>
    %256 = arith.mulf %253, %242 : vector<8x32xf32>
    %257 = arith.mulf %252, %254 : vector<8x32xf32>
    %258 = arith.addf %256, %257 : vector<8x32xf32>
    %259 = math.tanh %258 : vector<8x32xf32>
    %260 = arith.mulf %255, %259 : vector<8x32xf32>
    %261 = arith.truncf %260 : vector<8x32xf32> to vector<8x32xbf16>
    %cst_54 = arith.constant dense<0.000000e+00> : vector<8x128xf32>
    %262 = tpu.matmul %261, %192, %cst_54 {dimension_numbers = #tpu.dot_dimension_numbers<[1], [0], [0], [1], [0, 0, 1, 1], [], []>} : vector<8x32xbf16>, vector<32x128xbf16>, vector<8x128xf32> -> vector<8x128xf32>
    %263 = arith.addf %128, %262 : vector<8x128xf32>
    %264 = arith.mulf %263, %8 : vector<8x128xf32>
    %265 = math.tanh %264 : vector<8x128xf32>
    %266 = arith.mulf %265, %8 : vector<8x128xf32>
    %267 = arith.addf %266, %11 : vector<8x128xf32>
    %268 = vector.extract_strided_slice %267 {offsets = [0, 0], sizes = [8, 32], strides = [1, 1]} : vector<8x128xf32> to vector<8x32xf32>
    %269 = vector.extract_strided_slice %267 {offsets = [0, 32], sizes = [8, 32], strides = [1, 1]} : vector<8x128xf32> to vector<8x32xf32>
    %270 = vector.extract_strided_slice %267 {offsets = [0, 64], sizes = [8, 32], strides = [1, 1]} : vector<8x128xf32> to vector<8x32xf32>
    %271 = vector.extract_strided_slice %267 {offsets = [0, 96], sizes = [8, 32], strides = [1, 1]} : vector<8x128xf32> to vector<8x32xf32>
    %272 = arith.mulf %269, %258 : vector<8x32xf32>
    %273 = arith.mulf %268, %270 : vector<8x32xf32>
    %274 = arith.addf %272, %273 : vector<8x32xf32>
    %275 = math.tanh %274 : vector<8x32xf32>
    %276 = arith.mulf %271, %275 : vector<8x32xf32>
    %277 = arith.truncf %276 : vector<8x32xf32> to vector<8x32xbf16>
    %cst_55 = arith.constant dense<0.000000e+00> : vector<8x128xf32>
    %278 = tpu.matmul %277, %192, %cst_55 {dimension_numbers = #tpu.dot_dimension_numbers<[1], [0], [0], [1], [0, 0, 1, 1], [], []>} : vector<8x32xbf16>, vector<32x128xbf16>, vector<8x128xf32> -> vector<8x128xf32>
    %279 = arith.addf %147, %278 : vector<8x128xf32>
    %280 = arith.mulf %279, %8 : vector<8x128xf32>
    %281 = math.tanh %280 : vector<8x128xf32>
    %282 = arith.mulf %281, %8 : vector<8x128xf32>
    %283 = arith.addf %282, %11 : vector<8x128xf32>
    %284 = vector.extract_strided_slice %283 {offsets = [0, 0], sizes = [8, 32], strides = [1, 1]} : vector<8x128xf32> to vector<8x32xf32>
    %285 = vector.extract_strided_slice %283 {offsets = [0, 32], sizes = [8, 32], strides = [1, 1]} : vector<8x128xf32> to vector<8x32xf32>
    %286 = vector.extract_strided_slice %283 {offsets = [0, 64], sizes = [8, 32], strides = [1, 1]} : vector<8x128xf32> to vector<8x32xf32>
    %287 = vector.extract_strided_slice %283 {offsets = [0, 96], sizes = [8, 32], strides = [1, 1]} : vector<8x128xf32> to vector<8x32xf32>
    %288 = arith.mulf %285, %274 : vector<8x32xf32>
    %289 = arith.mulf %284, %286 : vector<8x32xf32>
    %290 = arith.addf %288, %289 : vector<8x32xf32>
    %291 = math.tanh %290 : vector<8x32xf32>
    %292 = arith.mulf %287, %291 : vector<8x32xf32>
    %293 = arith.truncf %292 : vector<8x32xf32> to vector<8x32xbf16>
    %cst_56 = arith.constant dense<0.000000e+00> : vector<8x128xf32>
    %294 = tpu.matmul %293, %192, %cst_56 {dimension_numbers = #tpu.dot_dimension_numbers<[1], [0], [0], [1], [0, 0, 1, 1], [], []>} : vector<8x32xbf16>, vector<32x128xbf16>, vector<8x128xf32> -> vector<8x128xf32>
    %295 = arith.addf %166, %294 : vector<8x128xf32>
    %296 = arith.mulf %295, %8 : vector<8x128xf32>
    %297 = math.tanh %296 : vector<8x128xf32>
    %298 = arith.mulf %297, %8 : vector<8x128xf32>
    %299 = arith.addf %298, %11 : vector<8x128xf32>
    %300 = vector.extract_strided_slice %299 {offsets = [0, 0], sizes = [8, 32], strides = [1, 1]} : vector<8x128xf32> to vector<8x32xf32>
    %301 = vector.extract_strided_slice %299 {offsets = [0, 32], sizes = [8, 32], strides = [1, 1]} : vector<8x128xf32> to vector<8x32xf32>
    %302 = vector.extract_strided_slice %299 {offsets = [0, 64], sizes = [8, 32], strides = [1, 1]} : vector<8x128xf32> to vector<8x32xf32>
    %303 = vector.extract_strided_slice %299 {offsets = [0, 96], sizes = [8, 32], strides = [1, 1]} : vector<8x128xf32> to vector<8x32xf32>
    %304 = arith.mulf %301, %290 : vector<8x32xf32>
    %305 = arith.mulf %300, %302 : vector<8x32xf32>
    %306 = arith.addf %304, %305 : vector<8x32xf32>
    %307 = math.tanh %306 : vector<8x32xf32>
    %308 = arith.mulf %303, %307 : vector<8x32xf32>
    %309 = arith.truncf %308 : vector<8x32xf32> to vector<8x32xbf16>
    %cst_57 = arith.constant dense<0.000000e+00> : vector<8x128xf32>
    %310 = tpu.matmul %309, %192, %cst_57 {dimension_numbers = #tpu.dot_dimension_numbers<[1], [0], [0], [1], [0, 0, 1, 1], [], []>} : vector<8x32xbf16>, vector<32x128xbf16>, vector<8x128xf32> -> vector<8x128xf32>
    %311 = arith.addf %185, %310 : vector<8x128xf32>
    %312 = arith.mulf %311, %8 : vector<8x128xf32>
    %313 = math.tanh %312 : vector<8x128xf32>
    %314 = arith.mulf %313, %8 : vector<8x128xf32>
    %315 = arith.addf %314, %11 : vector<8x128xf32>
    %316 = vector.extract_strided_slice %315 {offsets = [0, 0], sizes = [8, 32], strides = [1, 1]} : vector<8x128xf32> to vector<8x32xf32>
    %317 = vector.extract_strided_slice %315 {offsets = [0, 32], sizes = [8, 32], strides = [1, 1]} : vector<8x128xf32> to vector<8x32xf32>
    %318 = vector.extract_strided_slice %315 {offsets = [0, 64], sizes = [8, 32], strides = [1, 1]} : vector<8x128xf32> to vector<8x32xf32>
    %319 = vector.extract_strided_slice %315 {offsets = [0, 96], sizes = [8, 32], strides = [1, 1]} : vector<8x128xf32> to vector<8x32xf32>
    %320 = arith.mulf %317, %306 : vector<8x32xf32>
    %321 = arith.mulf %316, %318 : vector<8x32xf32>
    %322 = arith.addf %320, %321 : vector<8x32xf32>
    %323 = math.tanh %322 : vector<8x32xf32>
    %324 = arith.mulf %319, %323 : vector<8x32xf32>
    %c1_58 = arith.constant 1 : index
    %c0_59 = arith.constant 0 : index
    %c0_60 = arith.constant 0 : index
    %325 = vector.load %arg12[%c1_58, %c0_59, %c0_60] : memref<2x8x32xf32, #tpu.memory_space<vmem>>, vector<1x8x32xf32>
    %326 = vector.shape_cast %325 : vector<1x8x32xf32> to vector<8x32xf32>
    %327 = vector.shape_cast %324 : vector<8x32xf32> to vector<1x8x32xf32>
    tpu.vector_store %arg12[%c1_58, %c0_59, %c0_60], %327 {strides = array<i32>} : memref<2x8x32xf32, #tpu.memory_space<vmem>>, vector<1x8x32xf32>,
    %c1_61 = arith.constant 1 : index
    %c0_62 = arith.constant 0 : index
    %c0_63 = arith.constant 0 : index
    %328 = vector.load %arg13[%c1_61, %c0_62, %c0_63] : memref<2x8x32xf32, #tpu.memory_space<vmem>>, vector<1x8x32xf32>
    %329 = vector.shape_cast %328 : vector<1x8x32xf32> to vector<8x32xf32>
    %330 = vector.shape_cast %322 : vector<8x32xf32> to vector<1x8x32xf32>
    tpu.vector_store %arg13[%c1_61, %c0_62, %c0_63], %330 {strides = array<i32>} : memref<2x8x32xf32, #tpu.memory_space<vmem>>, vector<1x8x32xf32>,
    %cst_64 = arith.constant 0.000000e+00 : f32
    %331 = vector.broadcast %cst_64 : f32 to vector<8x32xf32>
    %332 = arith.maximumf %324, %331 : vector<8x32xf32>
    %c0_65 = arith.constant 0 : index
    %c0_66 = arith.constant 0 : index
    %333 = vector.load %arg9[%c0_65, %c0_66] : memref<1x32xf32, #tpu.memory_space<vmem>>, vector<1x32xf32>
    %334 = vector.broadcast %333 : vector<1x32xf32> to vector<8x32xf32>
    %335 = arith.mulf %332, %334 : vector<8x32xf32>
    %cst_67 = arith.constant dense<0.000000e+00> : vector<8xf32>
    %336 = vector.multi_reduction <add>, %335, %cst_67 [1] : vector<8x32xf32> to vector<8xf32>
    %337 = vector.shape_cast %336 : vector<8xf32> to vector<8x1xf32>
    %c0_68 = arith.constant 0 : index
    %c0_69 = arith.constant 0 : index
    %338 = vector.load %arg10[%c0_68, %c0_69] : memref<1x1xf32, #tpu.memory_space<vmem>>, vector<1x1xf32>
    %339 = vector.broadcast %338 : vector<1x1xf32> to vector<8x1xf32>
    %340 = arith.addf %337, %339 : vector<8x1xf32>
    %c0_70 = arith.constant 0 : index
    %c0_71 = arith.constant 0 : index
    %341 = vector.load %arg11[%c0_70, %c0_71] : memref<8x1xf32, #tpu.memory_space<vmem>>, vector<8x1xf32>
    tpu.vector_store %arg11[%c0_70, %c0_71], %340 {strides = array<i32>} : memref<8x1xf32, #tpu.memory_space<vmem>>, vector<8x1xf32>,
    return
  }
}

</mosaic_0001>

<bundles_post_ra>
// kernel: tpu_custom_call.1
= control target key start
LH: loop header
LB: loop body
LE: loop exit
PB: predicated region body
PF: predicated region fallthrough
CT: control target
= control target key end

     0   :  { %s1819_s0 = inlined_call_operand.vmem [shape: bf16[64,4], index: 0, kind: input, shape index: {}]   ;;  %s1820_s1 = inlined_call_operand.vmem [shape: f32[2,8,32], index: 1, kind: input, shape index: {}]   ;;  %s1821_s2 = inlined_call_operand.vmem [shape: f32[2,8,32], index: 2, kind: input, shape index: {}]   ;;  %s1822_s3 = inlined_call_operand.vmem [shape: bf16[4,128], index: 3, kind: input, shape index: {}]   ;;  %s1823_s4 = inlined_call_operand.hbm [shape: bf16[32,128], index: 4, kind: input, shape index: {}]   ;;  %s1824_s5 = inlined_call_operand.vmem [shape: f32[1,128], index: 5, kind: input, shape index: {}]   ;;  %s1825_s6 = inlined_call_operand.hbm [shape: bf16[32,128], index: 6, kind: input, shape index: {}]   ;;  %s1826_s7 = inlined_call_operand.hbm [shape: bf16[32,128], index: 7, kind: input, shape index: {}]   ;;  %s1827_s8 = inlined_call_operand.vmem [shape: f32[1,128], index: 8, kind: input, shape index: {}]   ;;  %s1828_s9 = inlined_call_operand.vmem [shape: f32[1,32], index: 9, kind: input, shape index: {}]   ;;  %s1829_s10 = inlined_call_operand.<no memory space> [shape: f32[1,1], index: 10, kind: input, shape index: {}]   ;;  %s1830_s11 = inlined_call_operand.vmem [shape: f32[8,1], index: 11, kind: output, shape index: {0}]   ;;  %s1831_s12 = inlined_call_operand.hbm [shape: f32[2,8,32], index: 12, kind: output, shape index: {1}]   ;;  %s1832_s13 = inlined_call_operand.hbm [shape: f32[2,8,32], index: 13, kind: output, shape index: {2}]  }
   0x1   :  { %v19_v0 = vstv %s1829_s10 }
   0x2   :  { %20 = vst [vmem:[#allocation2] sm:$0x1] %v19_v0 }
   0x3   :  { %21 = vsyncpa [#allocation4], 0 }
   0x4   :  { %22 = vsyncpa [#allocation7], 0 }
   0x5   :  { %23 = vsyncpa [#allocation5], 0 }
   0x6   :  { %24 = vsyncpa [#allocation11], 0  ;;  %s52_s29 = sshll.u32 %s1825_s6, 4  ;;  %s1397_s30 = smov [#allocation6]   ;;  %s53_s29 = int_to_ptr.hbm [resolvable:$true] %s52_s29 }
   0x7   :  { %s54_s14 = sshll.u32 %s1397_s30, 4  ;;  %s37_s17 = sshll.u32 %s1823_s4, 4  ;;  %s55_s14 = int_to_ptr.vmem [resolvable:$true] %s54_s14  ;;  %s38_s17 = int_to_ptr.hbm [resolvable:$true] %s37_s17 }
   0x8   :  { %s1398_s18 = smov 64   ;;  %s1399_s19 = smov 4  }
   0x9   :  { %60 = dma.hbm_to_vmem [thread:$0]  %s53_s29, 256, %s55_s14, [#allocation7], %s1398_s18, %s1398_s18, %s1399_s19  }
   0xa   :  { %s1400_s10 = smov [#allocation3]   ;;  %s65_s6 = sshll.u32 %s1826_s7, 4  ;;  %s66_s6 = int_to_ptr.hbm [resolvable:$true] %s65_s6 }
   0xb   :  { %s39_s20 = sshll.u32 %s1400_s10, 4  ;;  %s1401_s23 = smov [#allocation8]   ;;  %s40_s20 = int_to_ptr.vmem [resolvable:$true] %s39_s20 }
   0xc   :  { %45 = dma.hbm_to_vmem [thread:$0]  %s38_s17, 256, %s40_s20, [#allocation4], %s1398_s18, %s1398_s18, %s1399_s19  }
   0xd   :  { %s67_s24 = sshll.u32 %s1401_s23, 4  ;;  %s68_s24 = int_to_ptr.vmem [resolvable:$true] %s67_s24 }
   0xe   :  { %73 = dma.hbm_to_vmem [thread:$0]  %s66_s6, 256, %s68_s24, [#allocation7], %s1398_s18, %s1398_s18, %s1399_s19  }
   0xf   :  { %1389 = dma.done.wait [#allocation4], 256  }
  0x10   :  { %1390 = vsyncadd [#allocation4], 4294967040 }
  0x11   :  { %1391 = dma.done.wait [#allocation7], 512  }
  0x12   :  { %1392 = vsyncadd [#allocation7], 4294966784  ;;  %vm146_vm0 = vcmask 1041408   ;;  %v108_v1 = vld [vmem:[%s1822_s3] sm:$0x3]  ;;  %v1500_v2 = vld [vmem:[#allocation3 + $0x8] sm:$0xff]  ;;  %v93_v8 = vlaneseq }
  0x13   :  { %v148_v3 = vsel %vm146_vm0, %v108_v1, 0  ;;  %v1179_v4 = vld [vmem:[%s1819_s0] sm:$0xff]  ;;  %213 = vmatpush.bf16.msra.mxu1 %v1500_v2  ;;  %vm133_vm1 = vcmask 31744   ;;  %287 = vmatpush.bf16.msra.mxu3 %v1500_v2  ;;  %vm203_vm2 = vcmask 261120   ;;  %v1402_v13 = vmov 0.5   ;;  %s1403_s14 = smov 32  }
  0x14   :  { %v1505_v5 = vld [vmem:[#allocation3] sm:$0xff]  ;;  %157 = vmatpush.bf16.msra.mxu0 %v148_v3  ;;  %v94_v9 = vand.u32 127, %v93_v8  ;;  %v1521_v10 = vld [vmem:[%s1824_s5] ss:$0 sm:$0xff]  ;;  %v1541_v32 = vld [vmem:[#allocation6] sm:$0xff]  ;;  %s1404_s24 = smov 96  }
  0x15   :  { %v188_v6 = vld [vmem:[%s1820_s1] sm:$0xff]  ;;  %v1180_v54 = vld [vmem:[%s1819_s0 + $0x8] sm:$0xff]  ;;  %s1406_s26 = smov 128   ;;  %s1407_s27 = smov 8   ;;  %vm1065_vm6 = vcmask 7168  }
  0x16   :  { %v190_v7 = vpack.c.bf16 %v188_v6, %v188_v6  ;;  %vm95_vm3 = vcmp.ge.s32.totalorder %v94_v9, 64  ;;  %vm96_vm4 = vcmp.lt.s32.totalorder %v94_v9, 96  ;;  %v189_v23 = vld [vmem:[%s1821_s2] sm:$0xff]  ;;  %s1408_s28 = smov [#allocation10]   ;;  %s1088_s30 = sshll.u32 %s1832_s13, 4  ;;  %s1089_s30 = int_to_ptr.hbm [resolvable:$true] %s1088_s30 }
  0x17   :  { %1125 = vmatmul.msk.bf16.vlgmr.msra.gmra.mxu0 %vm133_vm1, %v1179_v4  ;;  %214 = vmatpush.bf16.msra.mxu1 %v1505_v5  ;;  %vm97_vm5 = vmand %vm95_vm3, %vm96_vm4  ;;  %v1538_v31 = vld [vmem:[#allocation6 + $0x8] sm:$0xff]  ;;  %s1086_s3 = sshll.u32 %s1408_s28, 4  ;;  %s1087_s3 = int_to_ptr.vmem [resolvable:$true] %s1086_s3 }
  0x18   :  { %562 = vmatpush.bf16.msrb.mxu0 %v1500_v2  ;;  %288 = vmatpush.bf16.msra.mxu3 %v1505_v5  ;;  %v1524_v14 = vsel %vm97_vm5, 1.0, %v1402_v13  ;;  %v1527_v20 = vsel %vm97_vm5, 0.0, %v1402_v13 }
  0x19   :  { %274 = vmatpush.bf16.msra.mxu2 %v1538_v31 }
  0x1a   :  { %1137 = vmatmul.msk.bf16.vlgmr.msra.gmra.mxu1 %vm203_vm2, %v190_v7 }
  0x1b   :  { %329 = vmatpush.bf16.msrb.mxu1 %v1538_v31 }
  0x1c   :  { %563 = vmatpush.bf16.msrb.mxu0 %v1505_v5  ;;  %384 = vmatpush.bf16.msrb.mxu3 %v1538_v31 }
  0x1d   :  { %275 = vmatpush.bf16.msra.mxu2 %v1541_v32 }
  0x1f   :  { %330 = vmatpush.bf16.msrb.mxu1 %v1541_v32 }
  0x20   :  { %385 = vmatpush.bf16.msrb.mxu3 %v1541_v32 }
  0x21   :  { %342 = vmatpush.bf16.msrb.mxu2 %v1500_v2 }
  0x23   :  { %397 = vmatpush.bf16.msra.mxu1 %v1500_v2 }
  0x25   :  { %343 = vmatpush.bf16.msrb.mxu2 %v1505_v5 }
  0x27   :  { %398 = vmatpush.bf16.msra.mxu1 %v1505_v5  ;;  %1126 = vmatmul.msk.bf16.gmra.mxu0 %vm133_vm1, %v1180_v54 }
  0x94   :  { %v159_v11 = vpop.f32.mrf.mxu0 }
  0x95   :  { %v160_v12 = vadd.f32 %v1521_v10, %v159_v11 }
  0x97   :  { %v216_v15 = vpop.f32.mrf.mxu1 }
  0x98   :  { %v220_v16 = vadd.f32 %v216_v15, %v160_v12 }
  0x9a   :  { %v221_v17 = vmul.f32 %v220_v16, %v1524_v14 }
  0x9c   :  { %1205 = vtanh.f32 %v221_v17  ;;  %v161_v37 = vpop.f32.mrf.mxu0 }
  0x9d   :  { %v162_v38 = vadd.f32 %v1521_v10, %v161_v37 }
  0x9f   :  { %v218_v18 = vpop.f32.mrf.mxu1 }
  0xa2   :  { %v1206_v19 = vpop.eup %1205 }
  0xa3   :  { %v223_v21 = vmul.f32 %v1206_v19, %v1524_v14 }
  0xa4   :  { %v164_v60 = vpop.f32.mrf.mxu0 }
  0xa5   :  { %v224_v22 = vadd.f32 %v223_v21, %v1527_v20  ;;  %v165_v61 = vadd.f32 %v1521_v10, %v164_v60 }
  0xa7   :  { %231 = vrot.lane.b32.xlu0 %v224_v22, %s1398_s18 }
  0xac   :  { %v166_v21 = vpop.f32.mrf.mxu0 }
  0xaf   :  { %226 = vrot.lane.b32.xlu0 %v189_v23, %s1403_s14 }
 0x119   :  { %v232_v24 = vpop.permute.xlu0 %231 }
 0x11a   :  { %v234_v25 = vmul.f32 %v232_v24, %v224_v22 }
 0x11c   :  { %236 = vrot.lane.b32.xlu1 %v234_v25, %s1403_s14 }
 0x121   :  { %v227_v26 = vpop.permute.xlu0 %226 }
 0x122   :  { %v229_v27 = vmul.f32 %v227_v26, %v224_v22 }
 0x18e   :  { %v237_v28 = vpop.permute.xlu1 %236 }
 0x18f   :  { %v239_v29 = vadd.f32 %v237_v28, %v229_v27 }
 0x191   :  { %1207 = vtanh.f32 %v239_v29 }
 0x197   :  { %v1208_v30 = vpop.eup %1207 }
 0x198   :  { %242 = vrot.lane.b32.xlu1 %v1208_v30, %s1398_s18 }
 0x20a   :  { %v243_v33 = vpop.permute.xlu1 %242 }
 0x20b   :  { %v245_v34 = vmul.f32 %v243_v33, %v224_v22  ;;  %v167_v22 = vadd.f32 %v1521_v10, %v166_v21 }
 0x20d   :  { %v246_v35 = vpack.c.bf16 %v245_v34, %v245_v34 }
 0x20f   :  { %251 = vrot.lane.b32.xlu2 %v246_v35, %s1403_s14 }
 0x269   :  { %v252_v36 = vpop.permute.xlu2 %251 }
 0x26a   :  { %1146 = vmatmul.msk.bf16.vlgmr.msra.gmra.mxu2 %vm203_vm2, %v252_v36  ;;  %1147 = vmatmul.msk.bf16.vlgmr.msra.gmra.mxu3 %vm203_vm2, %v252_v36 }
 0x26b   :  { %452 = vmatpush.bf16.msra.mxu3 %v1500_v2  ;;  %439 = vmatpush.bf16.msra.mxu2 %v1538_v31 }
 0x26f   :  { %453 = vmatpush.bf16.msra.mxu3 %v1505_v5  ;;  %440 = vmatpush.bf16.msra.mxu2 %v1541_v32 }
 0x2ed   :  { %v1560_v39 = vpop.f32.mrf.mxu2  ;;  %v290_v40 = vpop.f32.mrf.mxu3 }
 0x2ee   :  { %v294_v41 = vadd.f32 %v290_v40, %v162_v38 }
 0x2f0   :  { %v295_v42 = vmul.f32 %v294_v41, %v1524_v14  ;;  %v1181_v41 = vld [vmem:[%s1819_s0 + $0x10] sm:$0xff] }
 0x2f1   :  { %1127 = vmatmul.msk.bf16.gmra.mxu0 %vm133_vm1, %v1181_v41 }
 0x2f2   :  { %1209 = vtanh.f32 %v295_v42 }
 0x2f5   :  { %v279_v43 = vpop.f32.mrf.mxu2  ;;  %v292_v44 = vpop.f32.mrf.mxu3 }
 0x2f8   :  { %v1210_v45 = vpop.eup %1209 }
 0x2f9   :  { %v297_v46 = vmul.f32 %v1210_v45, %v1524_v14 }
 0x2fb   :  { %v298_v47 = vadd.f32 %v297_v46, %v1527_v20 }
 0x2fd   :  { %301 = vrot.lane.b32.xlu2 %v298_v47, %s1398_s18  ;;  %v299_v50 = vmul.f32 %v298_v47, %v239_v29 }
 0x357   :  { %v302_v48 = vpop.permute.xlu2 %301 }
 0x358   :  { %v304_v49 = vmul.f32 %v302_v48, %v298_v47 }
 0x35a   :  { %306 = vrot.lane.b32.xlu0 %v304_v49, %s1403_s14 }
 0x36e   :  { %v169_v46 = vpop.f32.mrf.mxu0 }
 0x3cc   :  { %v307_v51 = vpop.permute.xlu0 %306 }
 0x3cd   :  { %v309_v52 = vadd.f32 %v307_v51, %v299_v50 }
 0x3cf   :  { %1211 = vtanh.f32 %v309_v52 }
 0x3d5   :  { %v1212_v53 = vpop.eup %1211 }
 0x3d6   :  { %312 = vrot.lane.b32.xlu1 %v1212_v53, %s1398_s18 }
 0x448   :  { %v313_v55 = vpop.permute.xlu1 %312 }
 0x449   :  { %v315_v56 = vmul.f32 %v313_v55, %v298_v47  ;;  %v170_v47 = vadd.f32 %v1521_v10, %v169_v46 }
 0x44b   :  { %v316_v57 = vpack.c.bf16 %v315_v56, %v315_v56 }
 0x44d   :  { %318 = vrot.lane.b32.xlu2 %v316_v57, %s1403_s14 }
 0x4a7   :  { %v319_v58 = vpop.permute.xlu2 %318 }
 0x4a8   :  { %1148 = vmatmul.msk.bf16.vlgmr.msrb.gmra.mxu1 %vm203_vm2, %v319_v58  ;;  %1149 = vmatmul.msk.bf16.vlgmr.msrb.gmra.mxu2 %vm203_vm2, %v319_v58 }
 0x4a9   :  { %507 = vmatpush.bf16.msrb.mxu2 %v1500_v2  ;;  %494 = vmatpush.bf16.msrb.mxu1 %v1538_v31 }
 0x4ad   :  { %508 = vmatpush.bf16.msrb.mxu2 %v1505_v5  ;;  %495 = vmatpush.bf16.msrb.mxu1 %v1541_v32 }
 0x525   :  { %v1579_v59 = vpop.f32.mrf.mxu1 }
 0x52b   :  { %v345_v62 = vpop.f32.mrf.mxu2 }
 0x52c   :  { %v349_v63 = vadd.f32 %v345_v62, %v165_v61 }
 0x52d   :  { %v334_v0 = vpop.f32.mrf.mxu1 }
 0x52e   :  { %v350_v1 = vmul.f32 %v349_v63, %v1524_v14 }
 0x530   :  { %1213 = vtanh.f32 %v350_v1  ;;  %v171_v1 = vpop.f32.mrf.mxu0 }
 0x533   :  { %v347_v3 = vpop.f32.mrf.mxu2 }
 0x534   :  { %v172_v3 = vadd.f32 %v1521_v10, %v171_v1 }
 0x536   :  { %v1214_v4 = vpop.eup %1213 }
 0x537   :  { %v352_v6 = vmul.f32 %v1214_v4, %v1524_v14 }
 0x539   :  { %v353_v7 = vadd.f32 %v352_v6, %v1527_v20 }
 0x53b   :  { %356 = vrot.lane.b32.xlu0 %v353_v7, %s1398_s18  ;;  %v354_v11 = vmul.f32 %v353_v7, %v309_v52 }
 0x5ad   :  { %v357_v8 = vpop.permute.xlu0 %356 }
 0x5ae   :  { %v359_v9 = vmul.f32 %v357_v8, %v353_v7 }
 0x5b0   :  { %361 = vrot.lane.b32.xlu1 %v359_v9, %s1403_s14 }
 0x622   :  { %v362_v12 = vpop.permute.xlu1 %361 }
 0x623   :  { %v364_v13 = vadd.f32 %v362_v12, %v354_v11 }
 0x625   :  { %1215 = vtanh.f32 %v364_v13 }
 0x62b   :  { %v1216_v15 = vpop.eup %1215 }
 0x62c   :  { %367 = vrot.lane.b32.xlu2 %v1216_v15, %s1398_s18 }
 0x686   :  { %v368_v16 = vpop.permute.xlu2 %367 }
 0x687   :  { %v370_v17 = vmul.f32 %v368_v16, %v353_v7 }
 0x689   :  { %v371_v18 = vpack.c.bf16 %v370_v17, %v370_v17 }
 0x68b   :  { %373 = vrot.lane.b32.xlu0 %v371_v18, %s1403_s14 }
 0x6fd   :  { %v374_v19 = vpop.permute.xlu0 %373 }
 0x6fe   :  { %1150 = vmatmul.msk.bf16.vlgmr.msrb.gmra.mxu3 %vm203_vm2, %v374_v19  ;;  %1151 = vmatmul.msk.bf16.vlgmr.msra.gmra.mxu1 %vm203_vm2, %v374_v19 }
 0x6ff   :  { %549 = vmatpush.bf16.msrb.mxu3 %v1538_v31  ;;  %604 = vmatpush.bf16.msra.mxu1 %v1538_v31 }
 0x703   :  { %550 = vmatpush.bf16.msrb.mxu3 %v1541_v32  ;;  %605 = vmatpush.bf16.msra.mxu1 %v1541_v32 }
 0x77b   :  { %v400_v23 = vpop.f32.mrf.mxu1 }
 0x77c   :  { %v404_v24 = vadd.f32 %v400_v23, %v167_v22  ;;  %v1182_v22 = vld [vmem:[%s1819_s0 + $0x18] sm:$0xff] }
 0x77d   :  { %1128 = vmatmul.msk.bf16.gmra.mxu0 %vm133_vm1, %v1182_v22 }
 0x77e   :  { %v405_v25 = vmul.f32 %v404_v24, %v1524_v14 }
 0x780   :  { %1217 = vtanh.f32 %v405_v25 }
 0x781   :  { %v1597_v26 = vpop.f32.mrf.mxu3 }
 0x783   :  { %v402_v27 = vpop.f32.mrf.mxu1 }
 0x784   :  { %v1644_v27 = vld [vmem:[#allocation8 + $0x8] sm:$0xff] }
 0x785   :  { %706 = vmatpush.bf16.msra.mxu0 %v1644_v27 }
 0x786   :  { %v1218_v28 = vpop.eup %1217 }
 0x787   :  { %v407_v29 = vmul.f32 %v1218_v28, %v1524_v14  ;;  %v1647_v28 = vld [vmem:[#allocation8] sm:$0xff] }
 0x789   :  { %v389_v30 = vpop.f32.mrf.mxu3  ;;  %v408_v33 = vadd.f32 %v407_v29, %v1527_v20  ;;  %707 = vmatpush.bf16.msra.mxu0 %v1647_v28 }
 0x78a   :  { %v1161_v30 = vld [vmem:[%s1820_s1 + $0x8] sm:$0xff] }
 0x78b   :  { %411 = vrot.lane.b32.xlu1 %v408_v33, %s1398_s18  ;;  %v409_v36 = vmul.f32 %v408_v33, %v364_v13 }
 0x7fd   :  { %v412_v34 = vpop.permute.xlu1 %411 }
 0x7fe   :  { %v414_v35 = vmul.f32 %v412_v34, %v408_v33  ;;  %v174_v34 = vpop.f32.mrf.mxu0 }
 0x800   :  { %416 = vrot.lane.b32.xlu2 %v414_v35, %s1403_s14 }
 0x806   :  { %v1664_v35 = vpop.f32.mrf.mxu0 }
 0x85a   :  { %v417_v37 = vpop.permute.xlu2 %416 }
 0x85b   :  { %v419_v38 = vadd.f32 %v417_v37, %v409_v36  ;;  %v175_v36 = vadd.f32 %v1521_v10, %v174_v34  ;;  %v177_v34 = vadd.f32 %v1521_v10, %v1664_v35 }
 0x85d   :  { %1219 = vtanh.f32 %v419_v38 }
 0x863   :  { %v1220_v40 = vpop.eup %1219 }
 0x864   :  { %422 = vrot.lane.b32.xlu0 %v1220_v40, %s1398_s18 }
 0x8d6   :  { %v423_v42 = vpop.permute.xlu0 %422 }
 0x8d7   :  { %v425_v43 = vmul.f32 %v423_v42, %v408_v33  ;;  %v684_v33 = vpack.c.bf16 %v1161_v30, %v1161_v30 }
 0x8d9   :  { %v426_v44 = vpack.c.bf16 %v425_v43, %v425_v43 }
 0x8db   :  { %428 = vrot.lane.b32.xlu1 %v426_v44, %s1403_s14  ;;  %v1673_v44 = vld [vmem:[%s1827_s8] ss:$0 sm:$0xff] }
 0x94d   :  { %v429_v45 = vpop.permute.xlu1 %428 }
 0x94e   :  { %1152 = vmatmul.msk.bf16.vlgmr.msra.gmra.mxu2 %vm203_vm2, %v429_v45  ;;  %1153 = vmatmul.msk.bf16.vlgmr.msra.gmra.mxu3 %vm203_vm2, %v429_v45 }
 0x94f   :  { %617 = vmatpush.bf16.msra.mxu2 %v1500_v2  ;;  %659 = vmatpush.bf16.msra.mxu3 %v1538_v31 }
 0x953   :  { %618 = vmatpush.bf16.msra.mxu2 %v1505_v5  ;;  %660 = vmatpush.bf16.msra.mxu3 %v1541_v32 }
 0x9d1   :  { %v1616_v48 = vpop.f32.mrf.mxu2  ;;  %v455_v49 = vpop.f32.mrf.mxu3 }
 0x9d2   :  { %v459_v50 = vadd.f32 %v455_v49, %v170_v47  ;;  %v278_v49 = vadd.f32 %v1673_v44, %v1560_v39 }
 0x9d4   :  { %v460_v51 = vmul.f32 %v459_v50, %v1524_v14 }
 0x9d6   :  { %1221 = vtanh.f32 %v460_v51 }
 0x9d9   :  { %v444_v52 = vpop.f32.mrf.mxu2  ;;  %v457_v53 = vpop.f32.mrf.mxu3 }
 0x9da   :  { %v1162_v53 = vld [vmem:[%s1821_s2 + $0x8] sm:$0xff] }
 0x9dc   :  { %v1222_v54 = vpop.eup %1221 }
 0x9dd   :  { %v462_v2 = vmul.f32 %v1222_v54, %v1524_v14 }
 0x9df   :  { %v463_v31 = vadd.f32 %v462_v2, %v1527_v20 }
 0x9e1   :  { %466 = vrot.lane.b32.xlu2 %v463_v31, %s1398_s18  ;;  %v464_v55 = vmul.f32 %v463_v31, %v419_v38 }
 0xa3b   :  { %v467_v5 = vpop.permute.xlu2 %466 }
 0xa3c   :  { %v469_v32 = vmul.f32 %v467_v5, %v463_v31 }
 0xa3e   :  { %471 = vrot.lane.b32.xlu0 %v469_v32, %s1403_s14 }
 0xab0   :  { %v472_v56 = vpop.permute.xlu0 %471 }
 0xab1   :  { %v474_v57 = vadd.f32 %v472_v56, %v464_v55 }
 0xab3   :  { %1223 = vtanh.f32 %v474_v57 }
 0xab9   :  { %v1224_v58 = vpop.eup %1223 }
 0xaba   :  { %477 = vrot.lane.b32.xlu1 %v1224_v58, %s1398_s18 }
 0xb2c   :  { %v478_v60 = vpop.permute.xlu1 %477 }
 0xb2d   :  { %v480_v61 = vmul.f32 %v478_v60, %v463_v31 }
 0xb2f   :  { %v481_v62 = vpack.c.bf16 %v480_v61, %v480_v61 }
 0xb31   :  { %483 = vrot.lane.b32.xlu2 %v481_v62, %s1403_s14 }
 0xb8b   :  { %v484_v63 = vpop.permute.xlu2 %483 }
 0xb8c   :  { %1154 = vmatmul.msk.bf16.vlgmr.msrb.gmra.mxu1 %vm203_vm2, %v484_v63  ;;  %1155 = vmatmul.msk.bf16.vlgmr.msrb.gmra.mxu2 %vm203_vm2, %v484_v63 }
 0xb8d   :  { %752 = vmatpush.bf16.msrb.mxu1 %v1644_v27  ;;  %794 = vmatpush.bf16.msrb.mxu2 %v1644_v27 }
 0xb91   :  { %753 = vmatpush.bf16.msrb.mxu1 %v1647_v28  ;;  %795 = vmatpush.bf16.msrb.mxu2 %v1647_v28 }
 0xc09   :  { %v1627_v0 = vpop.f32.mrf.mxu1 }
 0xc0f   :  { %v510_v4 = vpop.f32.mrf.mxu2 }
 0xc10   :  { %v514_v6 = vadd.f32 %v510_v4, %v172_v3 }
 0xc11   :  { %v499_v7 = vpop.f32.mrf.mxu1 }
 0xc12   :  { %v515_v8 = vmul.f32 %v514_v6, %v1524_v14 }
 0xc14   :  { %1225 = vtanh.f32 %v515_v8 }
 0xc17   :  { %v512_v9 = vpop.f32.mrf.mxu2 }
 0xc1a   :  { %v1226_v11 = vpop.eup %1225 }
 0xc1b   :  { %v517_v12 = vmul.f32 %v1226_v11, %v1524_v14 }
 0xc1d   :  { %v518_v13 = vadd.f32 %v517_v12, %v1527_v20 }
 0xc1f   :  { %521 = vrot.lane.b32.xlu0 %v518_v13, %s1398_s18  ;;  %v519_v17 = vmul.f32 %v518_v13, %v474_v57 }
 0xc91   :  { %v522_v15 = vpop.permute.xlu0 %521 }
 0xc92   :  { %v524_v16 = vmul.f32 %v522_v15, %v518_v13 }
 0xc94   :  { %526 = vrot.lane.b32.xlu1 %v524_v16, %s1403_s14 }
 0xd06   :  { %v527_v18 = vpop.permute.xlu1 %526 }
 0xd07   :  { %v1635_v19 = vadd.f32 %v527_v18, %v519_v17 }
 0xd09   :  { %1227 = vtanh.f32 %v1635_v19 }
 0xd0f   :  { %v1228_v21 = vpop.eup %1227 }
 0xd10   :  { %532 = vrot.lane.b32.xlu2 %v1228_v21, %s1398_s18  ;;  %v333_v21 = vadd.f32 %v1673_v44, %v1579_v59 }
 0xd6a   :  { %v533_v23 = vpop.permute.xlu2 %532 }
 0xd6b   :  { %v535_v24 = vmul.f32 %v533_v23, %v518_v13 }
 0xd6d   :  { %v536_v25 = vpack.c.bf16 %v535_v24, %v535_v24 }
 0xd6f   :  { %538 = vrot.lane.b32.xlu0 %v536_v25, %s1403_s14 }
 0xde1   :  { %v539_v29 = vpop.permute.xlu0 %538 }
 0xde2   :  { %1156 = vmatmul.msk.bf16.vlgmr.msrb.gmra.mxu3 %vm203_vm2, %v539_v29  ;;  %1157 = vmatmul.msk.bf16.vlgmr.msrb.gmra.mxu0 %vm203_vm2, %v539_v29 }
 0xde3   :  { %836 = vmatpush.bf16.msrb.mxu3 %v1644_v27  ;;  %878 = vmatpush.bf16.msrb.mxu0 %v1644_v27 }
 0xde7   :  { %837 = vmatpush.bf16.msrb.mxu3 %v1647_v28  ;;  %879 = vmatpush.bf16.msrb.mxu0 %v1647_v28 }
 0xdf2   :  { %1171 = vmatmul.msk.bf16.vlgmr.msra.gmra.mxu0 %vm203_vm2, %v684_v33 }
 0xe5f   :  { %v565_v37 = vpop.f32.mrf.mxu0 }
 0xe60   :  { %v569_v38 = vadd.f32 %v565_v37, %v175_v36 }
 0xe62   :  { %v570_v40 = vmul.f32 %v569_v38, %v1524_v14 }
 0xe64   :  { %1229 = vtanh.f32 %v570_v40 }
 0xe65   :  { %v1668_v41 = vpop.f32.mrf.mxu3 }
 0xe67   :  { %v567_v42 = vpop.f32.mrf.mxu0 }
 0xe6a   :  { %v1230_v43 = vpop.eup %1229 }
 0xe6b   :  { %v572_v45 = vmul.f32 %v1230_v43, %v1524_v14 }
 0xe6d   :  { %v554_v46 = vpop.f32.mrf.mxu3  ;;  %v573_v47 = vadd.f32 %v572_v45, %v1527_v20 }
 0xe6f   :  { %576 = vrot.lane.b32.xlu1 %v573_v47, %s1398_s18  ;;  %v709_v50 = vpop.f32.mrf.mxu0  ;;  %v574_v63 = vmul.f32 %v573_v47, %v1635_v19 }
 0xe70   :  { %v713_v51 = vadd.f32 %v709_v50, %v278_v49 }
 0xe72   :  { %v714_v52 = vmul.f32 %v713_v51, %v1524_v14 }
 0xe74   :  { %1231 = vtanh.f32 %v714_v52 }
 0xe77   :  { %719 = vrot.lane.b32.xlu1 %v1162_v53, %s1403_s14  ;;  %v711_v54 = vpop.f32.mrf.mxu0 }
 0xe78   :  { %v388_v54 = vadd.f32 %v1673_v44, %v1597_v26 }
 0xe7a   :  { %v1232_v2 = vpop.eup %1231 }
 0xe7b   :  { %v716_v31 = vmul.f32 %v1232_v2, %v1524_v14 }
 0xe7d   :  { %v717_v5 = vadd.f32 %v716_v31, %v1527_v20 }
 0xe7f   :  { %724 = vrot.lane.b32.xlu2 %v717_v5, %s1398_s18 }
 0xed9   :  { %v725_v39 = vpop.permute.xlu2 %724 }
 0xeda   :  { %v727_v32 = vmul.f32 %v725_v39, %v717_v5 }
 0xedc   :  { %729 = vrot.lane.b32.xlu2 %v727_v32, %s1403_s14 }
 0xee1   :  { %v577_v55 = vpop.permute.xlu1 %576 }
 0xee2   :  { %v579_v56 = vmul.f32 %v577_v55, %v573_v47 }
 0xee4   :  { %581 = vrot.lane.b32.xlu0 %v579_v56, %s1403_s14 }
 0xee9   :  { %v720_v57 = vpop.permute.xlu1 %719 }
 0xeea   :  { %v722_v58 = vmul.f32 %v720_v57, %v717_v5 }
 0xf36   :  { %v730_v60 = vpop.permute.xlu2 %729 }
 0xf37   :  { %v732_v61 = vadd.f32 %v730_v60, %v722_v58 }
 0xf39   :  { %1233 = vtanh.f32 %v732_v61 }
 0xf3f   :  { %v1234_v62 = vpop.eup %1233 }
 0xf40   :  { %735 = vrot.lane.b32.xlu1 %v1234_v62, %s1398_s18 }
 0xf56   :  { %v582_v1 = vpop.permute.xlu0 %581 }
 0xf57   :  { %v1692_v3 = vadd.f32 %v582_v1, %v574_v63 }
 0xf59   :  { %1235 = vtanh.f32 %v1692_v3 }
 0xf5f   :  { %v1236_v4 = vpop.eup %1235 }
 0xf60   :  { %587 = vrot.lane.b32.xlu0 %v1236_v4, %s1398_s18 }
 0xfb2   :  { %v736_v6 = vpop.permute.xlu1 %735 }
 0xfb3   :  { %v738_v7 = vmul.f32 %v736_v6, %v717_v5 }
 0xfb5   :  { %v739_v8 = vpack.c.bf16 %v738_v7, %v738_v7 }
 0xfb7   :  { %741 = vrot.lane.b32.xlu0 %v739_v8, %s1403_s14 }
 0xfd2   :  { %v588_v9 = vpop.permute.xlu0 %587 }
 0xfd3   :  { %v590_v11 = vmul.f32 %v588_v9, %v573_v47 }
 0xfd5   :  { %v591_v12 = vpack.c.bf16 %v590_v11, %v590_v11 }
 0xfd7   :  { %593 = vrot.lane.b32.xlu2 %v591_v12, %s1403_s14 }
0x1029   :  { %v742_v15 = vpop.permute.xlu0 %741 }
0x1031   :  { %v594_v13 = vpop.permute.xlu2 %593 }
0x1032   :  { %1158 = vmatmul.msk.bf16.vlgmr.msra.gmra.mxu1 %vm203_vm2, %v594_v13  ;;  %1159 = vmatmul.msk.bf16.vlgmr.msra.gmra.mxu2 %vm203_vm2, %v594_v13 }
0x1033   :  { %920 = vmatpush.bf16.msra.mxu1 %v1644_v27  ;;  %962 = vmatpush.bf16.msra.mxu2 %v1644_v27 }
0x1037   :  { %921 = vmatpush.bf16.msra.mxu1 %v1647_v28  ;;  %963 = vmatpush.bf16.msra.mxu2 %v1647_v28 }
0x1042   :  { %1172 = vmatmul.msk.bf16.vlgmr.msrb.gmra.mxu1 %vm203_vm2, %v742_v15 }
0x10af   :  { %v1705_v16 = vpop.f32.mrf.mxu1 }
0x10b5   :  { %v620_v17 = vpop.f32.mrf.mxu2 }
0x10b6   :  { %v624_v36 = vadd.f32 %v620_v17, %v177_v34 }
0x10b7   :  { %v609_v18 = vpop.f32.mrf.mxu1 }
0x10b8   :  { %v625_v37 = vmul.f32 %v624_v36, %v1524_v14 }
0x10bd   :  { %v622_v19 = vpop.f32.mrf.mxu2 }
0x10be   :  { %v443_v19 = vadd.f32 %v1673_v44, %v1616_v48 }
0x10bf   :  { %v755_v22 = vpop.f32.mrf.mxu1 }
0x10c0   :  { %v759_v23 = vadd.f32 %v755_v22, %v333_v21 }
0x10c2   :  { %v760_v24 = vmul.f32 %v759_v23, %v1524_v14 }
0x10c4   :  { %1237 = vtanh.f32 %v760_v24 }
0x10c5   :  { %1239 = vtanh.f32 %v625_v37 }
0x10c7   :  { %v757_v25 = vpop.f32.mrf.mxu1 }
0x10ca   :  { %v1238_v29 = vpop.eup %1237 }
0x10cb   :  { %v762_v30 = vmul.f32 %v1238_v29, %v1524_v14  ;;  %v1240_v40 = vpop.eup %1239 }
0x10cc   :  { %v627_v42 = vmul.f32 %v1240_v40, %v1524_v14 }
0x10cd   :  { %v763_v33 = vadd.f32 %v762_v30, %v1527_v20 }
0x10ce   :  { %v628_v43 = vadd.f32 %v627_v42, %v1527_v20  ;;  %v498_v42 = vadd.f32 %v1673_v44, %v1627_v0 }
0x10cf   :  { %766 = vrot.lane.b32.xlu1 %v763_v33, %s1398_s18  ;;  %v764_v45 = vmul.f32 %v763_v33, %v732_v61 }
0x10d0   :  { %v629_v56 = vmul.f32 %v628_v43, %v1692_v3 }
0x1141   :  { %v767_v59 = vpop.permute.xlu1 %766 }
0x1142   :  { %v769_v38 = vmul.f32 %v767_v59, %v763_v33 }
0x1144   :  { %771 = vrot.lane.b32.xlu2 %v769_v38, %s1403_s14 }
0x114c   :  { %631 = vrot.lane.b32.xlu2 %v628_v43, %s1398_s18 }
0x119e   :  { %v772_v46 = vpop.permute.xlu2 %771 }
0x119f   :  { %v774_v47 = vadd.f32 %v772_v46, %v764_v45 }
0x11a1   :  { %1241 = vtanh.f32 %v774_v47 }
0x11a6   :  { %v632_v51 = vpop.permute.xlu2 %631 }
0x11a7   :  { %v1242_v10 = vpop.eup %1241  ;;  %v634_v52 = vmul.f32 %v632_v51, %v628_v43 }
0x11a8   :  { %777 = vrot.lane.b32.xlu0 %v1242_v10, %s1398_s18 }
0x121a   :  { %v778_v35 = vpop.permute.xlu0 %777 }
0x121b   :  { %v780_v49 = vmul.f32 %v778_v35, %v763_v33 }
0x121d   :  { %v781_v50 = vpack.c.bf16 %v780_v49, %v780_v49 }
0x121f   :  { %783 = vrot.lane.b32.xlu1 %v781_v50, %s1403_s14 }
0x1227   :  { %636 = vrot.lane.b32.xlu1 %v634_v52, %s1403_s14 }
0x1291   :  { %v784_v53 = vpop.permute.xlu1 %783 }
0x1292   :  { %1173 = vmatmul.msk.bf16.vlgmr.msrb.gmra.mxu2 %vm203_vm2, %v784_v53 }
0x1299   :  { %v637_v32 = vpop.permute.xlu1 %636 }
0x129a   :  { %v1729_v58 = vadd.f32 %v637_v32, %v629_v56  ;;  %v553_v32 = vadd.f32 %v1673_v44, %v1668_v41 }
0x1315   :  { %v797_v2 = vpop.f32.mrf.mxu2 }
0x1316   :  { %v801_v31 = vadd.f32 %v797_v2, %v388_v54 }
0x1318   :  { %v802_v5 = vmul.f32 %v801_v31, %v1524_v14 }
0x131a   :  { %1243 = vtanh.f32 %v802_v5 }
0x131b   :  { %1245 = vtanh.f32 %v1729_v58 }
0x131d   :  { %v799_v39 = vpop.f32.mrf.mxu2 }
0x1320   :  { %v1244_v55 = vpop.eup %1243 }
0x1321   :  { %v804_v57 = vmul.f32 %v1244_v55, %v1524_v14  ;;  %v1246_v26 = vpop.eup %1245 }
0x1323   :  { %v805_v60 = vadd.f32 %v804_v57, %v1527_v20 }
0x1325   :  { %808 = vrot.lane.b32.xlu0 %v805_v60, %s1398_s18  ;;  %v806_v4 = vmul.f32 %v805_v60, %v774_v47 }
0x132d   :  { %642 = vrot.lane.b32.xlu0 %v1246_v26, %s1398_s18 }
0x1397   :  { %v809_v61 = vpop.permute.xlu0 %808 }
0x1398   :  { %v811_v62 = vmul.f32 %v809_v61, %v805_v60 }
0x139a   :  { %813 = vrot.lane.b32.xlu2 %v811_v62, %s1403_s14 }
0x139f   :  { %v643_v63 = vpop.permute.xlu0 %642 }
0x13a0   :  { %v1736_v1 = vmul.f32 %v643_v63, %v628_v43 }
0x13a2   :  { %v646_v3 = vpack.c.bf16 %v1736_v1, %v1736_v1 }
0x13a4   :  { %648 = vrot.lane.b32.xlu2 %v646_v3, %s1403_s14 }
0x13f4   :  { %v814_v6 = vpop.permute.xlu2 %813 }
0x13f5   :  { %v816_v7 = vadd.f32 %v814_v6, %v806_v4 }
0x13f7   :  { %1247 = vtanh.f32 %v816_v7 }
0x13fd   :  { %v1248_v8 = vpop.eup %1247 }
0x13fe   :  { %819 = vrot.lane.b32.xlu1 %v1248_v8, %s1398_s18  ;;  %v649_v9 = vpop.permute.xlu2 %648 }
0x13ff   :  { %1160 = vmatmul.msk.bf16.vlgmr.msra.gmra.mxu3 %vm203_vm2, %v649_v9 }
0x1400   :  { %1004 = vmatpush.bf16.msra.mxu3 %v1644_v27 }
0x1404   :  { %1005 = vmatpush.bf16.msra.mxu3 %v1647_v28 }
0x1470   :  { %v820_v11 = vpop.permute.xlu1 %819 }
0x1471   :  { %v822_v12 = vmul.f32 %v820_v11, %v805_v60 }
0x1473   :  { %v823_v13 = vpack.c.bf16 %v822_v12, %v822_v12 }
0x1475   :  { %825 = vrot.lane.b32.xlu0 %v823_v13, %s1403_s14  ;;  %v608_v13 = vadd.f32 %v1673_v44, %v1705_v16 }
0x1482   :  { %v1746_v15 = vpop.f32.mrf.mxu3 }
0x148a   :  { %v664_v17 = vpop.f32.mrf.mxu3 }
0x14e7   :  { %v826_v18 = vpop.permute.xlu0 %825 }
0x14e8   :  { %1174 = vmatmul.msk.bf16.vlgmr.msrb.gmra.mxu3 %vm203_vm2, %v826_v18 }
0x156b   :  { %v839_v21 = vpop.f32.mrf.mxu3 }
0x156c   :  { %v843_v22 = vadd.f32 %v839_v21, %v443_v19 }
0x156e   :  { %v844_v27 = vmul.f32 %v843_v22, %v1524_v14 }
0x1570   :  { %1249 = vtanh.f32 %v844_v27 }
0x1573   :  { %v841_v28 = vpop.f32.mrf.mxu3 }
0x1576   :  { %v1250_v23 = vpop.eup %1249 }
0x1577   :  { %v846_v24 = vmul.f32 %v1250_v23, %v1524_v14 }
0x1579   :  { %v847_v25 = vadd.f32 %v846_v24, %v1527_v20 }
0x157b   :  { %850 = vrot.lane.b32.xlu1 %v847_v25, %s1398_s18  ;;  %v848_v33 = vmul.f32 %v847_v25, %v816_v7 }
0x15ed   :  { %v851_v29 = vpop.permute.xlu1 %850 }
0x15ee   :  { %v853_v30 = vmul.f32 %v851_v29, %v847_v25 }
0x15f0   :  { %855 = vrot.lane.b32.xlu2 %v853_v30, %s1403_s14 }
0x164a   :  { %v856_v34 = vpop.permute.xlu2 %855 }
0x164b   :  { %v858_v48 = vadd.f32 %v856_v34, %v848_v33 }
0x164d   :  { %1251 = vtanh.f32 %v858_v48 }
0x1653   :  { %v1252_v36 = vpop.eup %1251 }
0x1654   :  { %861 = vrot.lane.b32.xlu0 %v1252_v36, %s1398_s18 }
0x16c6   :  { %v862_v37 = vpop.permute.xlu0 %861 }
0x16c7   :  { %v864_v59 = vmul.f32 %v862_v37, %v847_v25  ;;  %v663_v37 = vadd.f32 %v1673_v44, %v1746_v15 }
0x16c9   :  { %v865_v38 = vpack.c.bf16 %v864_v59, %v864_v59 }
0x16cb   :  { %867 = vrot.lane.b32.xlu1 %v865_v38, %s1403_s14 }
0x173d   :  { %v868_v40 = vpop.permute.xlu1 %867 }
0x173e   :  { %1175 = vmatmul.msk.bf16.vlgmr.msrb.gmra.mxu0 %vm203_vm2, %v868_v40 }
0x17bb   :  { %v881_v43 = vpop.f32.mrf.mxu0 }
0x17bc   :  { %v885_v45 = vadd.f32 %v881_v43, %v498_v42 }
0x17be   :  { %v886_v46 = vmul.f32 %v885_v45, %v1524_v14 }
0x17c0   :  { %1253 = vtanh.f32 %v886_v46 }
0x17c3   :  { %v883_v47 = vpop.f32.mrf.mxu0 }
0x17c4   :  { %v1203_v47 = vld [vmem:[%s1828_s9] ss:$0 sm:$0xff]  ;;  %s1405_s9 = smov [#allocation9]  }
0x17c5   :  { %s1073_s4 = sshll.u32 %s1405_s9, 4  ;;  %s1074_s4 = int_to_ptr.vmem [resolvable:$true] %s1073_s4 }
0x17c6   :  { %v1254_v10 = vpop.eup %1253 }
0x17c7   :  { %v888_v35 = vmul.f32 %v1254_v10, %v1524_v14 }
0x17c9   :  { %v889_v49 = vadd.f32 %v888_v35, %v1527_v20 }
0x17cb   :  { %892 = vrot.lane.b32.xlu2 %v889_v49, %s1398_s18  ;;  %v890_v52 = vmul.f32 %v889_v49, %v858_v48 }
0x1825   :  { %v893_v50 = vpop.permute.xlu2 %892 }
0x1826   :  { %v895_v51 = vmul.f32 %v893_v50, %v889_v49 }
0x1828   :  { %897 = vrot.lane.b32.xlu0 %v895_v51, %s1403_s14 }
0x189a   :  { %v898_v53 = vpop.permute.xlu0 %897 }
0x189b   :  { %v900_v0 = vadd.f32 %v898_v53, %v890_v52 }
0x189d   :  { %1255 = vtanh.f32 %v900_v0 }
0x18a3   :  { %v1256_v54 = vpop.eup %1255 }
0x18a4   :  { %903 = vrot.lane.b32.xlu1 %v1256_v54, %s1398_s18 }
0x1916   :  { %v904_v2 = vpop.permute.xlu1 %903 }
0x1917   :  { %v906_v31 = vmul.f32 %v904_v2, %v889_v49 }
0x1919   :  { %v907_v5 = vpack.c.bf16 %v906_v31, %v906_v31 }
0x191b   :  { %909 = vrot.lane.b32.xlu2 %v907_v5, %s1403_s14  ;;  %v1204_v5 = vld [vmem:[#allocation2] ss:$0 sm:$0xff] }
0x1975   :  { %v910_v39 = vpop.permute.xlu2 %909 }
0x1976   :  { %1176 = vmatmul.msk.bf16.vlgmr.msra.gmra.mxu1 %vm203_vm2, %v910_v39 }
0x19f3   :  { %v923_v55 = vpop.f32.mrf.mxu1 }
0x19f4   :  { %v927_v56 = vadd.f32 %v923_v55, %v553_v32 }
0x19f6   :  { %v928_v57 = vmul.f32 %v927_v56, %v1524_v14 }
0x19f8   :  { %1257 = vtanh.f32 %v928_v57 }
0x19fb   :  { %v925_v60 = vpop.f32.mrf.mxu1 }
0x19fe   :  { %v1258_v26 = vpop.eup %1257 }
0x19ff   :  { %v930_v61 = vmul.f32 %v1258_v26, %v1524_v14 }
0x1a01   :  { %v931_v62 = vadd.f32 %v930_v61, %v1527_v20 }
0x1a03   :  { %934 = vrot.lane.b32.xlu0 %v931_v62, %s1398_s18  ;;  %v932_v4 = vmul.f32 %v931_v62, %v900_v0 }
0x1a75   :  { %v935_v63 = vpop.permute.xlu0 %934 }
0x1a76   :  { %v937_v3 = vmul.f32 %v935_v63, %v931_v62 }
0x1a78   :  { %939 = vrot.lane.b32.xlu1 %v937_v3, %s1403_s14 }
0x1aea   :  { %v940_v6 = vpop.permute.xlu1 %939 }
0x1aeb   :  { %v942_v41 = vadd.f32 %v940_v6, %v932_v4 }
0x1aed   :  { %1259 = vtanh.f32 %v942_v41 }
0x1af3   :  { %v1260_v7 = vpop.eup %1259 }
0x1af4   :  { %945 = vrot.lane.b32.xlu2 %v1260_v7, %s1398_s18 }
0x1b4e   :  { %v946_v8 = vpop.permute.xlu2 %945 }
0x1b4f   :  { %v948_v9 = vmul.f32 %v946_v8, %v931_v62 }
0x1b51   :  { %v949_v11 = vpack.c.bf16 %v948_v9, %v948_v9 }
0x1b53   :  { %951 = vrot.lane.b32.xlu0 %v949_v11, %s1403_s14 }
0x1bc5   :  { %v952_v12 = vpop.permute.xlu0 %951 }
0x1bc6   :  { %1177 = vmatmul.msk.bf16.vlgmr.msra.gmra.mxu2 %vm203_vm2, %v952_v12 }
0x1c49   :  { %v965_v17 = vpop.f32.mrf.mxu2 }
0x1c4a   :  { %v969_v18 = vadd.f32 %v965_v17, %v608_v13 }
0x1c4c   :  { %v970_v19 = vmul.f32 %v969_v18, %v1524_v14 }
0x1c4e   :  { %1261 = vtanh.f32 %v970_v19 }
0x1c51   :  { %v967_v21 = vpop.f32.mrf.mxu2 }
0x1c54   :  { %v1262_v22 = vpop.eup %1261 }
0x1c55   :  { %v972_v27 = vmul.f32 %v1262_v22, %v1524_v14 }
0x1c57   :  { %v973_v28 = vadd.f32 %v972_v27, %v1527_v20 }
0x1c59   :  { %976 = vrot.lane.b32.xlu1 %v973_v28, %s1398_s18  ;;  %v974_v25 = vmul.f32 %v973_v28, %v942_v41 }
0x1ccb   :  { %v977_v23 = vpop.permute.xlu1 %976 }
0x1ccc   :  { %v979_v24 = vmul.f32 %v977_v23, %v973_v28 }
0x1cce   :  { %981 = vrot.lane.b32.xlu2 %v979_v24, %s1403_s14 }
0x1d28   :  { %v982_v29 = vpop.permute.xlu2 %981 }
0x1d29   :  { %v984_v16 = vadd.f32 %v982_v29, %v974_v25 }
0x1d2b   :  { %1263 = vtanh.f32 %v984_v16 }
0x1d31   :  { %v1264_v30 = vpop.eup %1263 }
0x1d32   :  { %987 = vrot.lane.b32.xlu0 %v1264_v30, %s1398_s18 }
0x1da4   :  { %v988_v33 = vpop.permute.xlu0 %987 }
0x1da5   :  { %v990_v34 = vmul.f32 %v988_v33, %v973_v28 }
0x1da7   :  { %v991_v48 = vpack.c.bf16 %v990_v34, %v990_v34 }
0x1da9   :  { %993 = vrot.lane.b32.xlu1 %v991_v48, %s1403_s14 }
0x1e1b   :  { %v994_v36 = vpop.permute.xlu1 %993 }
0x1e1c   :  { %1178 = vmatmul.msk.bf16.vlgmr.msra.gmra.mxu3 %vm203_vm2, %v994_v36 }
0x1e9f   :  { %v1007_v59 = vpop.f32.mrf.mxu3 }
0x1ea0   :  { %v1011_v38 = vadd.f32 %v1007_v59, %v663_v37 }
0x1ea2   :  { %v1012_v40 = vmul.f32 %v1011_v38, %v1524_v14 }
0x1ea4   :  { %1265 = vtanh.f32 %v1012_v40 }
0x1ea7   :  { %v1009_v42 = vpop.f32.mrf.mxu3 }
0x1eaa   :  { %v1266_v43 = vpop.eup %1265 }
0x1eab   :  { %v1014_v45 = vmul.f32 %v1266_v43, %v1524_v14 }
0x1ead   :  { %v1015_v46 = vadd.f32 %v1014_v45, %v1527_v20 }
0x1eaf   :  { %1018 = vrot.lane.b32.xlu2 %v1015_v46, %s1398_s18  ;;  %v1016_v14 = vmul.f32 %v1015_v46, %v984_v16 }
0x1eb7   :  { %1049 = vrot.lane.b32.xlu2 %v1203_v47, %s1404_s24 }
0x1ebf   :  { %667 = vrot.lane.b32.xlu2 %v1736_v1, %s1403_s14 }
0x1f09   :  { %v1019_v44 = vpop.permute.xlu2 %1018 }
0x1f0a   :  { %v1021_v15 = vmul.f32 %v1019_v44, %v1015_v46 }
0x1f0c   :  { %1023 = vrot.lane.b32.xlu0 %v1021_v15, %s1403_s14 }
0x1f11   :  { %v1050_v10 = vpop.permute.xlu2 %1049 }
0x1f19   :  { %v668_v35 = vpop.permute.xlu2 %667 }
0x1f1a   :  { %670 = vst.msk [vmem:[#allocation9] sm:$0xff] %vm203_vm2, %v668_v35 }
0x1f7e   :  { %v1024_v20 = vpop.permute.xlu0 %1023 }
0x1f7f   :  { %v1026_v49 = vadd.f32 %v1024_v20, %v1016_v14 }
0x1f81   :  { %1267 = vtanh.f32 %v1026_v49 }
0x1f87   :  { %v1268_v50 = vpop.eup %1267 }
0x1f88   :  { %1029 = vrot.lane.b32.xlu1 %v1268_v50, %s1398_s18  ;;  %s1075_s18 = sshll.u32 %s1831_s12, 4  ;;  %s1076_s18 = int_to_ptr.hbm [resolvable:$true] %s1075_s18 }
0x1ffa   :  { %v1030_v51 = vpop.permute.xlu1 %1029 }
0x1ffb   :  { %v1032_v52 = vmul.f32 %v1030_v51, %v1015_v46 }
0x1ffd   :  { %v1045_v53 = vmax.f32 %v1032_v52, 0.0  ;;  %1034 = vrot.lane.b32.xlu2 %v1032_v52, %s1403_s14 }
0x1fff   :  { %v1052_v1 = vmul.f32 %v1050_v10, %v1045_v53 }
0x2001   :  { %1054 = vrot.lane.b32.xlu0 %v1052_v1, %s1403_s14 }
0x2009   :  { %672 = vrot.lane.b32.xlu0 %v1729_v58, %s1404_s24 }
0x2011   :  { %1040 = vrot.lane.b32.xlu0 %v1026_v49, %s1404_s24 }
0x2057   :  { %v1035_v0 = vpop.permute.xlu2 %1034 }
0x2058   :  { %1038 = vst.msk [vmem:[#allocation9 + $0x8] sm:$0xff] %vm203_vm2, %v1035_v0 }
0x2059   :  { %1081 = dma.vmem_to_hbm [thread:$0]  %s1074_s4, 256, %s1076_s18, [#allocation5], %s1406_s26, %s1406_s26, %s1407_s27  }
0x2073   :  { %v1055_v54 = vpop.permute.xlu0 %1054 }
0x2074   :  { %v1057_v2 = vsel %vm203_vm2, %v1055_v54, 0.0 }
0x2075   :  { %1058 = vadd.xlane.f32.xlu1 %v1057_v2 }
0x207b   :  { %v673_v58 = vpop.permute.xlu0 %672 }
0x207c   :  { %675 = vst.msk [vmem:[#allocation10] sm:$0xff] %vm203_vm2, %v673_v58 }
0x2083   :  { %v1041_v31 = vpop.permute.xlu0 %1040 }
0x2084   :  { %1044 = vst.msk [vmem:[#allocation10 + $0x8] sm:$0xff] %vm203_vm2, %v1041_v31 }
0x2085   :  { %1094 = dma.vmem_to_hbm [thread:$0]  %s1087_s3, 256, %s1089_s30, [#allocation11], %s1406_s26, %s1406_s26, %s1407_s27  }
0x20e8   :  { %v1059_v39 = vpop.xlane.xlu1 %1058 }
0x20e9   :  { %v1064_v32 = vadd.f32 %v1204_v5, %v1059_v39 }
0x20eb   :  { %1066 = vst.msk [vmem:[%s1830_s11] sm:$0xff] %vm1065_vm6, %v1064_v32 }
0x20ec   :  { %1393 = dma.done.wait [#allocation5], 256  }
0x20ed   :  { %1394 = vsyncadd [#allocation5], 4294967040 }
0x20ee   :  { %1395 = dma.done.wait [#allocation11], 256  }
0x20ef   :  { %1396 = vsyncadd [#allocation11], 4294967040 }
0x20f0   :  { %1105 = vsyncpa [#allocation4], 1 }
0x20f1   :  { %1106 = vsyncpa [#allocation7], 1 }
0x20f2   :  { %1107 = vsyncpa [#allocation5], 1 }
0x20f3   :  { %1108 = vsyncpa [#allocation11], 1 }

</bundles_post_ra>
